<compile_context>
chip_gen: v7x
topology: tpu7x:2x2x1
jax: 0.10.0
libtpu: 0.0.40
codegen_flags: <defaults>
</compile_context>

<pallas_src>
import functools

import numpy as np

import jax
import jax.numpy as jnp
from jax.experimental import pallas as pl
from jax.experimental.pallas import tpu as pltpu

EPS = 1e-5      # PyTorch BatchNorm2d default eps
_LANE = 128     # lane width used to pad the head / output columns


def _round_up(x, m):
    return (x + m - 1) // m * m


# ---------------------------------------------------------------------------
# Static layer metadata (pure Python ints, usable at trace time)
# ---------------------------------------------------------------------------
def _layer_meta(input_channels, filters, h, w):
    c0 = input_channels + 1                      # +1 for the mask channel
    chans = (c0, filters, 2 * filters, 4 * filters)
    layers = []
    m_off = g_off = gt_off = 0
    hi, wi = h, w
    for l in range(3):
        cin, cout = chans[l], chans[l + 1]
        ho, wo = hi // 2, wi // 2
        s = ho * wo
        d_in = hi * wi * cin
        d_out = s * cout
        layers.append(dict(
            cin=cin, cout=cout, hi=hi, wi=wi, s=s,
            d_in=d_in, d_out=d_out,
            m_off=m_off, g_off=g_off, gt_off=gt_off,
            in_layout="nchw" if l == 0 else "nhwc"))
        m_off += _round_up(d_in, 16)             # bf16 sublane packing
        g_off += 8 + _round_up(d_out, 8)         # 8 BN rows + G rows
        gt_off += _round_up(cout, 8)
        hi, wi = ho, wo
    return dict(layers=tuple(layers),
                m_rows=m_off, m_cols=layers[0]["d_out"],
                g_rows=g_off, g_cols=chans[3],
                gt_rows=gt_off,
                feat=layers[2]["d_out"], s3=layers[2]["s"], c3=chans[3])


# ---------------------------------------------------------------------------
# Fused Pallas kernel
# ---------------------------------------------------------------------------
def _variational_kernel(a0_ref, m_ref, g_ref, gt_ref, head_ref, out_ref,
                        *, layers, n_real, feat):
    f32 = jnp.float32
    n_pad = a0_ref.shape[0]

    # Row-select masks for stacking two (1, d) rows into one (2, d) operand
    # (avoids any in-kernel concatenate).
    rid = jax.lax.broadcasted_iota(jnp.int32, (2, 1), 0)
    row0 = (rid == 0).astype(f32)                # [[1],[0]]
    row1 = 1.0 - row0                            # [[0],[1]]

    def stack2(top, bot):                        # (1,d),(1,d) -> (2,d)
        return top * row0 + bot * row1

    # Padded batch rows are zero on entry; keep them zero after every layer so
    # the training-mode BN statistics stay exact (divide by n_real, not n_pad).
    if n_real < n_pad:
        bid = jax.lax.broadcasted_iota(jnp.int32, (n_pad, 1), 0)
        batch_mask = (bid < n_real).astype(f32)
    else:
        batch_mask = None

    h = a0_ref[...]                              # (n_pad, Hin*Win*Cin) f32
    for lyr in layers:
        d_in, d_out = lyr["d_in"], lyr["d_out"]
        c, s = lyr["cout"], lyr["s"]

        # --- Conv2d(k=4, s=2, p=1): one lane-dense bf16 MXU matmul ---------
        m = m_ref[lyr["m_off"]:lyr["m_off"] + d_in, 0:d_out]
        y = jnp.dot(h.astype(jnp.bfloat16), m,
                    preferred_element_type=f32)                  # (n_pad, d_out)

        # --- BatchNorm2d training-mode stats over n_real * s samples -------
        colsum = jnp.sum(y, axis=0, keepdims=True)               # (1, d_out)
        colsq = jnp.sum(y * y, axis=0, keepdims=True)            # (1, d_out)
        stats = stack2(colsum, colsq)                            # (2, d_out)
        bn = g_ref[lyr["g_off"]:lyr["g_off"] + 2, 0:c]           # gamma, beta
        grp = g_ref[lyr["g_off"] + 8:lyr["g_off"] + 8 + d_out, 0:c]
        # One grouping matmul for both stats rows (MXU acc is f32; grp is 0/1).
        stats_c = jnp.dot(stats, grp, preferred_element_type=f32)
        stats_c = stats_c * (1.0 / float(n_real * s))            # (2, c)
        mean_c = stats_c[0:1, :]
        # Single-pass variance: clamp against catastrophic cancellation.
        var_c = jnp.maximum(stats_c[1:2, :] - mean_c * mean_c, 0.0)
        scale_c = bn[0:1, :] * jax.lax.rsqrt(var_c + EPS)        # gamma/sqrt(v+e)
        shift_c = bn[1:2, :] - mean_c * scale_c                  # beta - m*scale
        aff_c = stack2(scale_c, shift_c)                         # (2, c)
        gt = gt_ref[lyr["gt_off"]:lyr["gt_off"] + c, 0:d_out]    # (c, d_out)
        # One grouping matmul broadcasts both affine rows to the lane axis.
        aff = jnp.dot(aff_c, gt, preferred_element_type=f32)     # (2, d_out)

        # --- affine + ReLU (+ keep padded batch rows at exactly zero) ------
        h = jnp.maximum(y * aff[0:1, :] + aff[1:2, :], 0.0)
        if batch_mask is not None:
            h = h * batch_mask

    # --- global average pool + 1x1-conv head, folded into ONE matmul -------
    head_w = head_ref[0:feat, :]                                 # (feat, lanes)
    head_b = head_ref[feat:feat + 1, :]                          # (1, lanes)
    out_ref[...] = jnp.dot(h, head_w, preferred_element_type=jnp.float32) + head_b


# ---------------------------------------------------------------------------
# Parameter preparation (one-time, outside the per-call path)
# ---------------------------------------------------------------------------
def _one_hot_sel(size_in, size_out):
    p = np.zeros((size_in, size_out, 4), np.float32)
    for o in range(size_out):
        for k in range(4):
            i = 2 * o - 1 + k                    # stride=2, padding=1
            if 0 <= i < size_in:
                p[i, o, k] = 1.0
    return p


def _fold_conv(w_oihw, h_in, w_in, in_layout):
    """Fold Conv2d(k=4,s=2,p=1) into a dense (d_in, d_out) matrix.

    Zero padding is baked in.  Input-row ordering:
      "nhwc": rows = (h, w, c)   (layout of a previous layer's output)
      "nchw": rows = (c, h, w)   (layout of the raw NCHW-flat input + mask,
                                  i.e. the layout transpose is folded here)
    """
    cin = int(w_oihw.shape[1])
    ho, wo = h_in // 2, w_in // 2
    ph = jnp.asarray(_one_hot_sel(h_in, ho))     # (Hin, Ho, 4)
    pw = jnp.asarray(_one_hot_sel(w_in, wo))     # (Win, Wo, 4)
    w_t = jnp.transpose(w_oihw, (2, 3, 1, 0))    # (kh, kw, cin, cout)
    eq = "hak,wbl,klcd->hwcabd" if in_layout == "nhwc" else "hak,wbl,klcd->chwabd"
    m = jnp.einsum(eq, ph, pw, w_t)
    cout = int(w_oihw.shape[0])
    return m.reshape(h_in * w_in * cin, ho * wo * cout).astype(jnp.bfloat16)


def init_params(key, input_channels, filters, z_dim, image_shape):
    h, w = image_shape
    assert h % 8 == 0 and w % 8 == 0, "three stride-2 convs need /8 divisibility"
    assert 2 * z_dim <= _LANE, "head padding assumes 2*z_dim <= 128"
    meta = _layer_meta(input_channels, filters, h, w)
    layers = meta["layers"]
    k = jax.random.split(key, 5)

    def conv_w(kk, cout, cin):
        fan_in = cin * 16
        return jax.random.normal(kk, (cout, cin, 4, 4), jnp.float32) * (
            2.0 / fan_in) ** 0.5
    # Conv biases intentionally omitted: a per-channel bias right before
    # training-mode BatchNorm is cancelled exactly by the batch-mean subtract.
    conv_ws = [conv_w(k[i], layers[i]["cout"], layers[i]["cin"]) for i in range(3)]

    # --- packed folded conv matrices (bf16, one array, row-sectioned) -------
    m_all = jnp.zeros((meta["m_rows"], meta["m_cols"]), jnp.bfloat16)
    for lyr, cw in zip(layers, conv_ws):
        m = _fold_conv(cw, lyr["hi"], lyr["wi"], lyr["in_layout"])
        m_all = m_all.at[lyr["m_off"]:lyr["m_off"] + lyr["d_in"],
                         0:lyr["d_out"]].set(m)

    # --- packed BN params + channel-grouping matrices (f32) -----------------
    g_all = np.zeros((meta["g_rows"], meta["g_cols"]), np.float32)
    gt_all = np.zeros((meta["gt_rows"], meta["m_cols"]), np.float32)
    last_grp = None
    for lyr in layers:
        c, d_out = lyr["cout"], lyr["d_out"]
        g_all[lyr["g_off"], :c] = 1.0                        # gamma = 1
        # beta row (g_off + 1) stays 0                       # beta = 0
        grp = np.zeros((d_out, c), np.float32)
        grp[np.arange(d_out), np.arange(d_out) % c] = 1.0    # lane j -> ch j%c
        g_all[lyr["g_off"] + 8:lyr["g_off"] + 8 + d_out, :c] = grp
        gt_all[lyr["gt_off"]:lyr["gt_off"] + c, :d_out] = grp.T
        last_grp = grp

    # --- global-average-pool + 1x1-conv head folded into one matrix ---------
    f3, s3, feat = meta["c3"], meta["s3"], meta["feat"]
    w_fc = jax.random.normal(k[3], (f3, 2 * z_dim), jnp.float32) * (2.0 / f3) ** 0.5
    b_fc = jax.random.normal(k[4], (2 * z_dim,), jnp.float32)
    head_w = jnp.dot(jnp.asarray(last_grp), w_fc) * (1.0 / s3)   # (feat, 2z)
    head_cols = _round_up(2 * z_dim, _LANE)                      # lane-dense out
    head = jnp.zeros((feat + 1, head_cols), jnp.float32)
    head = head.at[0:feat, 0:2 * z_dim].set(head_w)
    head = head.at[feat, 0:2 * z_dim].set(b_fc)

    return {"m_all": m_all,
            "g_all": jnp.asarray(g_all),
            "gt_all": jnp.asarray(gt_all),
            "head": head}


# ---------------------------------------------------------------------------
# Forward pass (matches variational.forward semantics)
# ---------------------------------------------------------------------------
def _vmem():
    return pl.BlockSpec(memory_space=pltpu.MemorySpace.VMEM)


@functools.partial(jax.jit,
                   static_argnames=("input_channels", "filters", "z_dim",
                                    "image_h", "image_w"))
def variational_forward(params, x_nchw, mask, *, input_channels, filters,
                        z_dim, image_h, image_w):
    meta = _layer_meta(input_channels, filters, image_h, image_w)
    n = x_nchw.shape[0]
    n_pad = max(8, _round_up(n, 8))              # fill the f32 sublanes

    # torch.cat([input, mask.unsqueeze(1)], 1): the NCHW->NHWC permutation is
    # folded into M1's rows, so only a cheap contiguous concat (+ optional
    # zero row-pad) remains on the wrapper side.
    a0 = jnp.concatenate([x_nchw.reshape(n, -1).astype(jnp.float32),
                          mask.reshape(n, -1).astype(jnp.float32)], axis=1)
    if n_pad != n:
        a0 = jnp.pad(a0, ((0, n_pad - n), (0, 0)))

    kernel = functools.partial(_variational_kernel,
                               layers=meta["layers"], n_real=n,
                               feat=meta["feat"])
    out_cols = params["head"].shape[1]
    out = pl.pallas_call(
        kernel,
        out_shape=jax.ShapeDtypeStruct((n_pad, out_cols), jnp.float32),
        in_specs=[_vmem()] * 5,
        out_specs=_vmem(),
        compiler_params=pltpu.CompilerParams(
            vmem_limit_bytes=32 * 1024 * 1024),
    )(a0, params["m_all"], params["g_all"], params["gt_all"], params["head"])

    out = out[:n, :2 * z_dim]
    mu = out[:, :z_dim]
    log_sigma = out[:, z_dim:]
    sigma = jnp.exp(log_sigma)
    # TODO(synk): torch.distributions Independent(Normal(mu, sigma), 1) has no
    # Pallas/array equivalent; the distribution is represented by (mu, sigma).
    dist = (mu, sigma)
    return dist, mu, log_sigma


if __name__ == "__main__":
    key = jax.random.PRNGKey(0)
    kp, kx, km = jax.random.split(key, 3)

    input_channels, filters, z_dim = 4, 8, 6
    image_shape = (16, 16)                       # divisible by 8
    batch = 2

    params = init_params(kp, input_channels, filters, z_dim, image_shape)
    x = jax.random.normal(kx, (batch, input_channels, *image_shape), jnp.float32)
    mask = (jax.random.uniform(km, (batch, *image_shape)) > 0.5).astype(jnp.float32)

    (dist_mu, dist_sigma), mu, log_sigma = variational_forward(
        params, x, mask,
        input_channels=input_channels, filters=filters, z_dim=z_dim,
        image_h=image_shape[0], image_w=image_shape[1])
    jax.block_until_ready((mu, log_sigma, dist_sigma))

    assert mu.shape == (batch, z_dim), mu.shape
    assert log_sigma.shape == (batch, z_dim), log_sigma.shape
    assert dist_sigma.shape == (batch, z_dim), dist_sigma.shape
    assert bool(jnp.all(jnp.isfinite(mu))) and bool(jnp.all(jnp.isfinite(log_sigma)))
    print("KERNEL_OK")
</pallas_src>

<mosaic_0001>
module attributes {stable_mosaic.version = 11 : i64} {
  func.func @_variational_kernel(%arg0: memref<8x1280xf32, #tpu.memory_space<vmem>>, %arg1: memref<2048x512xbf16, #tpu.memory_space<vmem>>, %arg2: memref<920x32xf32, #tpu.memory_space<vmem>>, %arg3: memref<56x512xf32, #tpu.memory_space<vmem>>, %arg4: memref<129x128xf32, #tpu.memory_space<vmem>>, %arg5: memref<8x128xf32, #tpu.memory_space<vmem>>) attributes {dimension_semantics = [], scalar_prefetch = 0 : i64, scratch_operands = 0 : i64, tpu.core_type = #tpu.core_type<tc>} {
    %0 = tpu.iota {dimensions = array<i32: 0>} : vector<2x1xi32>
    %c0_i32 = arith.constant 0 : i32
    %1 = vector.broadcast %c0_i32 : i32 to vector<2x1xi32>
    %2 = arith.cmpi eq, %0, %1 : vector<2x1xi32>
    %3 = arith.extui %2 : vector<2x1xi1> to vector<2x1xi32>
    %4 = arith.sitofp %3 : vector<2x1xi32> to vector<2x1xf32>
    %cst = arith.constant 1.000000e+00 : f32
    %5 = vector.broadcast %cst : f32 to vector<2x1xf32>
    %6 = arith.subf %5, %4 : vector<2x1xf32>
    %7 = tpu.iota {dimensions = array<i32: 0>} : vector<8x1xi32>
    %c2_i32 = arith.constant 2 : i32
    %8 = vector.broadcast %c2_i32 : i32 to vector<8x1xi32>
    %9 = arith.cmpi slt, %7, %8 : vector<8x1xi32>
    %10 = arith.extui %9 : vector<8x1xi1> to vector<8x1xi32>
    %11 = arith.sitofp %10 : vector<8x1xi32> to vector<8x1xf32>
    %c0 = arith.constant 0 : index
    %c0_0 = arith.constant 0 : index
    %12 = vector.load %arg0[%c0, %c0_0] : memref<8x1280xf32, #tpu.memory_space<vmem>>, vector<8x1280xf32>
    %c0_1 = arith.constant 0 : index
    %c0_2 = arith.constant 0 : index
    %13 = vector.load %arg1[%c0_1, %c0_2] : memref<2048x512xbf16, #tpu.memory_space<vmem>>, vector<1280x512xbf16>
    %14 = arith.truncf %12 : vector<8x1280xf32> to vector<8x1280xbf16>
    %cst_3 = arith.constant dense<0.000000e+00> : vector<8x512xf32>
    %15 = tpu.matmul %14, %13, %cst_3 {dimension_numbers = #tpu.dot_dimension_numbers<[1], [0], [0], [1], [0, 0, 1, 1], [], []>} : vector<8x1280xbf16>, vector<1280x512xbf16>, vector<8x512xf32> -> vector<8x512xf32>
    %cst_4 = arith.constant dense<0.000000e+00> : vector<512xf32>
    %16 = vector.multi_reduction <add>, %15, %cst_4 [0] : vector<8x512xf32> to vector<512xf32>
    %17 = vector.shape_cast %16 : vector<512xf32> to vector<1x512xf32>
    %18 = arith.mulf %15, %15 : vector<8x512xf32>
    %cst_5 = arith.constant dense<0.000000e+00> : vector<512xf32>
    %19 = vector.multi_reduction <add>, %18, %cst_5 [0] : vector<8x512xf32> to vector<512xf32>
    %20 = vector.shape_cast %19 : vector<512xf32> to vector<1x512xf32>
    %21 = vector.broadcast %17 : vector<1x512xf32> to vector<2x512xf32>
    %22 = vector.broadcast %4 : vector<2x1xf32> to vector<2x512xf32>
    %23 = arith.mulf %21, %22 : vector<2x512xf32>
    %24 = vector.broadcast %20 : vector<1x512xf32> to vector<2x512xf32>
    %25 = vector.broadcast %6 : vector<2x1xf32> to vector<2x512xf32>
    %26 = arith.mulf %24, %25 : vector<2x512xf32>
    %27 = arith.addf %23, %26 : vector<2x512xf32>
    %c0_6 = arith.constant 0 : index
    %c0_7 = arith.constant 0 : index
    %28 = vector.load %arg2[%c0_6, %c0_7] : memref<920x32xf32, #tpu.memory_space<vmem>>, vector<2x8xf32>
    %c8 = arith.constant 8 : index
    %c0_8 = arith.constant 0 : index
    %29 = vector.load %arg2[%c8, %c0_8] : memref<920x32xf32, #tpu.memory_space<vmem>>, vector<512x8xf32>
    %cst_9 = arith.constant dense<0.000000e+00> : vector<2x8xf32>
    %30 = tpu.matmul %27, %29, %cst_9 {dimension_numbers = #tpu.dot_dimension_numbers<[1], [0], [0], [1], [0, 0, 1, 1], [], []>} : vector<2x512xf32>, vector<512x8xf32>, vector<2x8xf32> -> vector<2x8xf32>
    %cst_10 = arith.constant 7.812500e-03 : f32
    %31 = vector.broadcast %cst_10 : f32 to vector<2x8xf32>
    %32 = arith.mulf %30, %31 : vector<2x8xf32>
    %33 = vector.extract_strided_slice %32 {offsets = [0, 0], sizes = [1, 8], strides = [1, 1]} : vector<2x8xf32> to vector<1x8xf32>
    %34 = vector.extract_strided_slice %32 {offsets = [1, 0], sizes = [1, 8], strides = [1, 1]} : vector<2x8xf32> to vector<1x8xf32>
    %35 = arith.mulf %33, %33 : vector<1x8xf32>
    %36 = arith.subf %34, %35 : vector<1x8xf32>
    %cst_11 = arith.constant 0.000000e+00 : f32
    %37 = vector.broadcast %cst_11 : f32 to vector<1x8xf32>
    %38 = arith.maximumf %36, %37 : vector<1x8xf32>
    %39 = vector.extract_strided_slice %28 {offsets = [0, 0], sizes = [1, 8], strides = [1, 1]} : vector<2x8xf32> to vector<1x8xf32>
    %cst_12 = arith.constant 9.99999974E-6 : f32
    %40 = vector.broadcast %cst_12 : f32 to vector<1x8xf32>
    %41 = arith.addf %38, %40 : vector<1x8xf32>
    %42 = math.rsqrt %41 : vector<1x8xf32>
    %43 = arith.mulf %39, %42 : vector<1x8xf32>
    %44 = vector.extract_strided_slice %28 {offsets = [1, 0], sizes = [1, 8], strides = [1, 1]} : vector<2x8xf32> to vector<1x8xf32>
    %45 = arith.mulf %33, %43 : vector<1x8xf32>
    %46 = arith.subf %44, %45 : vector<1x8xf32>
    %47 = vector.broadcast %43 : vector<1x8xf32> to vector<2x8xf32>
    %48 = vector.broadcast %4 : vector<2x1xf32> to vector<2x8xf32>
    %49 = arith.mulf %47, %48 : vector<2x8xf32>
    %50 = vector.broadcast %46 : vector<1x8xf32> to vector<2x8xf32>
    %51 = vector.broadcast %6 : vector<2x1xf32> to vector<2x8xf32>
    %52 = arith.mulf %50, %51 : vector<2x8xf32>
    %53 = arith.addf %49, %52 : vector<2x8xf32>
    %c0_13 = arith.constant 0 : index
    %c0_14 = arith.constant 0 : index
    %54 = vector.load %arg3[%c0_13, %c0_14] : memref<56x512xf32, #tpu.memory_space<vmem>>, vector<8x512xf32>
    %cst_15 = arith.constant dense<0.000000e+00> : vector<2x512xf32>
    %55 = tpu.matmul %53, %54, %cst_15 {dimension_numbers = #tpu.dot_dimension_numbers<[1], [0], [0], [1], [0, 0, 1, 1], [], []>} : vector<2x8xf32>, vector<8x512xf32>, vector<2x512xf32> -> vector<2x512xf32>
    %56 = vector.extract_strided_slice %55 {offsets = [0, 0], sizes = [1, 512], strides = [1, 1]} : vector<2x512xf32> to vector<1x512xf32>
    %57 = vector.broadcast %56 : vector<1x512xf32> to vector<8x512xf32>
    %58 = arith.mulf %15, %57 : vector<8x512xf32>
    %59 = vector.extract_strided_slice %55 {offsets = [1, 0], sizes = [1, 512], strides = [1, 1]} : vector<2x512xf32> to vector<1x512xf32>
    %60 = vector.broadcast %59 : vector<1x512xf32> to vector<8x512xf32>
    %61 = arith.addf %58, %60 : vector<8x512xf32>
    %cst_16 = arith.constant 0.000000e+00 : f32
    %62 = vector.broadcast %cst_16 : f32 to vector<8x512xf32>
    %63 = arith.maximumf %61, %62 : vector<8x512xf32>
    %64 = vector.broadcast %11 : vector<8x1xf32> to vector<8x512xf32>
    %65 = arith.mulf %63, %64 : vector<8x512xf32>
    %c1280 = arith.constant 1280 : index
    %c0_17 = arith.constant 0 : index
    %66 = vector.load %arg1[%c1280, %c0_17] : memref<2048x512xbf16, #tpu.memory_space<vmem>>, vector<512x256xbf16>
    %67 = arith.truncf %65 : vector<8x512xf32> to vector<8x512xbf16>
    %cst_18 = arith.constant dense<0.000000e+00> : vector<8x256xf32>
    %68 = tpu.matmul %67, %66, %cst_18 {dimension_numbers = #tpu.dot_dimension_numbers<[1], [0], [0], [1], [0, 0, 1, 1], [], []>} : vector<8x512xbf16>, vector<512x256xbf16>, vector<8x256xf32> -> vector<8x256xf32>
    %cst_19 = arith.constant dense<0.000000e+00> : vector<256xf32>
    %69 = vector.multi_reduction <add>, %68, %cst_19 [0] : vector<8x256xf32> to vector<256xf32>
    %70 = vector.shape_cast %69 : vector<256xf32> to vector<1x256xf32>
    %71 = arith.mulf %68, %68 : vector<8x256xf32>
    %cst_20 = arith.constant dense<0.000000e+00> : vector<256xf32>
    %72 = vector.multi_reduction <add>, %71, %cst_20 [0] : vector<8x256xf32> to vector<256xf32>
    %73 = vector.shape_cast %72 : vector<256xf32> to vector<1x256xf32>
    %74 = vector.broadcast %70 : vector<1x256xf32> to vector<2x256xf32>
    %75 = vector.broadcast %4 : vector<2x1xf32> to vector<2x256xf32>
    %76 = arith.mulf %74, %75 : vector<2x256xf32>
    %77 = vector.broadcast %73 : vector<1x256xf32> to vector<2x256xf32>
    %78 = vector.broadcast %6 : vector<2x1xf32> to vector<2x256xf32>
    %79 = arith.mulf %77, %78 : vector<2x256xf32>
    %80 = arith.addf %76, %79 : vector<2x256xf32>
    %c520 = arith.constant 520 : index
    %c0_21 = arith.constant 0 : index
    %81 = vector.load %arg2[%c520, %c0_21] : memref<920x32xf32, #tpu.memory_space<vmem>>, vector<2x16xf32>
    %c528 = arith.constant 528 : index
    %c0_22 = arith.constant 0 : index
    %82 = vector.load %arg2[%c528, %c0_22] : memref<920x32xf32, #tpu.memory_space<vmem>>, vector<256x16xf32>
    %cst_23 = arith.constant dense<0.000000e+00> : vector<2x16xf32>
    %83 = tpu.matmul %80, %82, %cst_23 {dimension_numbers = #tpu.dot_dimension_numbers<[1], [0], [0], [1], [0, 0, 1, 1], [], []>} : vector<2x256xf32>, vector<256x16xf32>, vector<2x16xf32> -> vector<2x16xf32>
    %cst_24 = arith.constant 3.125000e-02 : f32
    %84 = vector.broadcast %cst_24 : f32 to vector<2x16xf32>
    %85 = arith.mulf %83, %84 : vector<2x16xf32>
    %86 = vector.extract_strided_slice %85 {offsets = [0, 0], sizes = [1, 16], strides = [1, 1]} : vector<2x16xf32> to vector<1x16xf32>
    %87 = vector.extract_strided_slice %85 {offsets = [1, 0], sizes = [1, 16], strides = [1, 1]} : vector<2x16xf32> to vector<1x16xf32>
    %88 = arith.mulf %86, %86 : vector<1x16xf32>
    %89 = arith.subf %87, %88 : vector<1x16xf32>
    %cst_25 = arith.constant 0.000000e+00 : f32
    %90 = vector.broadcast %cst_25 : f32 to vector<1x16xf32>
    %91 = arith.maximumf %89, %90 : vector<1x16xf32>
    %92 = vector.extract_strided_slice %81 {offsets = [0, 0], sizes = [1, 16], strides = [1, 1]} : vector<2x16xf32> to vector<1x16xf32>
    %cst_26 = arith.constant 9.99999974E-6 : f32
    %93 = vector.broadcast %cst_26 : f32 to vector<1x16xf32>
    %94 = arith.addf %91, %93 : vector<1x16xf32>
    %95 = math.rsqrt %94 : vector<1x16xf32>
    %96 = arith.mulf %92, %95 : vector<1x16xf32>
    %97 = vector.extract_strided_slice %81 {offsets = [1, 0], sizes = [1, 16], strides = [1, 1]} : vector<2x16xf32> to vector<1x16xf32>
    %98 = arith.mulf %86, %96 : vector<1x16xf32>
    %99 = arith.subf %97, %98 : vector<1x16xf32>
    %100 = vector.broadcast %96 : vector<1x16xf32> to vector<2x16xf32>
    %101 = vector.broadcast %4 : vector<2x1xf32> to vector<2x16xf32>
    %102 = arith.mulf %100, %101 : vector<2x16xf32>
    %103 = vector.broadcast %99 : vector<1x16xf32> to vector<2x16xf32>
    %104 = vector.broadcast %6 : vector<2x1xf32> to vector<2x16xf32>
    %105 = arith.mulf %103, %104 : vector<2x16xf32>
    %106 = arith.addf %102, %105 : vector<2x16xf32>
    %c8_27 = arith.constant 8 : index
    %c0_28 = arith.constant 0 : index
    %107 = vector.load %arg3[%c8_27, %c0_28] : memref<56x512xf32, #tpu.memory_space<vmem>>, vector<16x256xf32>
    %cst_29 = arith.constant dense<0.000000e+00> : vector<2x256xf32>
    %108 = tpu.matmul %106, %107, %cst_29 {dimension_numbers = #tpu.dot_dimension_numbers<[1], [0], [0], [1], [0, 0, 1, 1], [], []>} : vector<2x16xf32>, vector<16x256xf32>, vector<2x256xf32> -> vector<2x256xf32>
    %109 = vector.extract_strided_slice %108 {offsets = [0, 0], sizes = [1, 256], strides = [1, 1]} : vector<2x256xf32> to vector<1x256xf32>
    %110 = vector.broadcast %109 : vector<1x256xf32> to vector<8x256xf32>
    %111 = arith.mulf %68, %110 : vector<8x256xf32>
    %112 = vector.extract_strided_slice %108 {offsets = [1, 0], sizes = [1, 256], strides = [1, 1]} : vector<2x256xf32> to vector<1x256xf32>
    %113 = vector.broadcast %112 : vector<1x256xf32> to vector<8x256xf32>
    %114 = arith.addf %111, %113 : vector<8x256xf32>
    %cst_30 = arith.constant 0.000000e+00 : f32
    %115 = vector.broadcast %cst_30 : f32 to vector<8x256xf32>
    %116 = arith.maximumf %114, %115 : vector<8x256xf32>
    %117 = vector.broadcast %11 : vector<8x1xf32> to vector<8x256xf32>
    %118 = arith.mulf %116, %117 : vector<8x256xf32>
    %c1792 = arith.constant 1792 : index
    %c0_31 = arith.constant 0 : index
    %119 = vector.load %arg1[%c1792, %c0_31] : memref<2048x512xbf16, #tpu.memory_space<vmem>>, vector<256x128xbf16>
    %120 = arith.truncf %118 : vector<8x256xf32> to vector<8x256xbf16>
    %cst_32 = arith.constant dense<0.000000e+00> : vector<8x128xf32>
    %121 = tpu.matmul %120, %119, %cst_32 {dimension_numbers = #tpu.dot_dimension_numbers<[1], [0], [0], [1], [0, 0, 1, 1], [], []>} : vector<8x256xbf16>, vector<256x128xbf16>, vector<8x128xf32> -> vector<8x128xf32>
    %cst_33 = arith.constant dense<0.000000e+00> : vector<128xf32>
    %122 = vector.multi_reduction <add>, %121, %cst_33 [0] : vector<8x128xf32> to vector<128xf32>
    %123 = vector.shape_cast %122 : vector<128xf32> to vector<1x128xf32>
    %124 = arith.mulf %121, %121 : vector<8x128xf32>
    %cst_34 = arith.constant dense<0.000000e+00> : vector<128xf32>
    %125 = vector.multi_reduction <add>, %124, %cst_34 [0] : vector<8x128xf32> to vector<128xf32>
    %126 = vector.shape_cast %125 : vector<128xf32> to vector<1x128xf32>
    %127 = vector.broadcast %123 : vector<1x128xf32> to vector<2x128xf32>
    %128 = vector.broadcast %4 : vector<2x1xf32> to vector<2x128xf32>
    %129 = arith.mulf %127, %128 : vector<2x128xf32>
    %130 = vector.broadcast %126 : vector<1x128xf32> to vector<2x128xf32>
    %131 = vector.broadcast %6 : vector<2x1xf32> to vector<2x128xf32>
    %132 = arith.mulf %130, %131 : vector<2x128xf32>
    %133 = arith.addf %129, %132 : vector<2x128xf32>
    %c784 = arith.constant 784 : index
    %c0_35 = arith.constant 0 : index
    %134 = vector.load %arg2[%c784, %c0_35] : memref<920x32xf32, #tpu.memory_space<vmem>>, vector<2x32xf32>
    %c792 = arith.constant 792 : index
    %c0_36 = arith.constant 0 : index
    %135 = vector.load %arg2[%c792, %c0_36] : memref<920x32xf32, #tpu.memory_space<vmem>>, vector<128x32xf32>
    %cst_37 = arith.constant dense<0.000000e+00> : vector<2x32xf32>
    %136 = tpu.matmul %133, %135, %cst_37 {dimension_numbers = #tpu.dot_dimension_numbers<[1], [0], [0], [1], [0, 0, 1, 1], [], []>} : vector<2x128xf32>, vector<128x32xf32>, vector<2x32xf32> -> vector<2x32xf32>
    %cst_38 = arith.constant 1.250000e-01 : f32
    %137 = vector.broadcast %cst_38 : f32 to vector<2x32xf32>
    %138 = arith.mulf %136, %137 : vector<2x32xf32>
    %139 = vector.extract_strided_slice %138 {offsets = [0, 0], sizes = [1, 32], strides = [1, 1]} : vector<2x32xf32> to vector<1x32xf32>
    %140 = vector.extract_strided_slice %138 {offsets = [1, 0], sizes = [1, 32], strides = [1, 1]} : vector<2x32xf32> to vector<1x32xf32>
    %141 = arith.mulf %139, %139 : vector<1x32xf32>
    %142 = arith.subf %140, %141 : vector<1x32xf32>
    %cst_39 = arith.constant 0.000000e+00 : f32
    %143 = vector.broadcast %cst_39 : f32 to vector<1x32xf32>
    %144 = arith.maximumf %142, %143 : vector<1x32xf32>
    %145 = vector.extract_strided_slice %134 {offsets = [0, 0], sizes = [1, 32], strides = [1, 1]} : vector<2x32xf32> to vector<1x32xf32>
    %cst_40 = arith.constant 9.99999974E-6 : f32
    %146 = vector.broadcast %cst_40 : f32 to vector<1x32xf32>
    %147 = arith.addf %144, %146 : vector<1x32xf32>
    %148 = math.rsqrt %147 : vector<1x32xf32>
    %149 = arith.mulf %145, %148 : vector<1x32xf32>
    %150 = vector.extract_strided_slice %134 {offsets = [1, 0], sizes = [1, 32], strides = [1, 1]} : vector<2x32xf32> to vector<1x32xf32>
    %151 = arith.mulf %139, %149 : vector<1x32xf32>
    %152 = arith.subf %150, %151 : vector<1x32xf32>
    %153 = vector.broadcast %149 : vector<1x32xf32> to vector<2x32xf32>
    %154 = vector.broadcast %4 : vector<2x1xf32> to vector<2x32xf32>
    %155 = arith.mulf %153, %154 : vector<2x32xf32>
    %156 = vector.broadcast %152 : vector<1x32xf32> to vector<2x32xf32>
    %157 = vector.broadcast %6 : vector<2x1xf32> to vector<2x32xf32>
    %158 = arith.mulf %156, %157 : vector<2x32xf32>
    %159 = arith.addf %155, %158 : vector<2x32xf32>
    %c24 = arith.constant 24 : index
    %c0_41 = arith.constant 0 : index
    %160 = vector.load %arg3[%c24, %c0_41] : memref<56x512xf32, #tpu.memory_space<vmem>>, vector<32x128xf32>
    %cst_42 = arith.constant dense<0.000000e+00> : vector<2x128xf32>
    %161 = tpu.matmul %159, %160, %cst_42 {dimension_numbers = #tpu.dot_dimension_numbers<[1], [0], [0], [1], [0, 0, 1, 1], [], []>} : vector<2x32xf32>, vector<32x128xf32>, vector<2x128xf32> -> vector<2x128xf32>
    %162 = vector.extract_strided_slice %161 {offsets = [0, 0], sizes = [1, 128], strides = [1, 1]} : vector<2x128xf32> to vector<1x128xf32>
    %163 = vector.broadcast %162 : vector<1x128xf32> to vector<8x128xf32>
    %164 = arith.mulf %121, %163 : vector<8x128xf32>
    %165 = vector.extract_strided_slice %161 {offsets = [1, 0], sizes = [1, 128], strides = [1, 1]} : vector<2x128xf32> to vector<1x128xf32>
    %166 = vector.broadcast %165 : vector<1x128xf32> to vector<8x128xf32>
    %167 = arith.addf %164, %166 : vector<8x128xf32>
    %cst_43 = arith.constant 0.000000e+00 : f32
    %168 = vector.broadcast %cst_43 : f32 to vector<8x128xf32>
    %169 = arith.maximumf %167, %168 : vector<8x128xf32>
    %170 = vector.broadcast %11 : vector<8x1xf32> to vector<8x128xf32>
    %171 = arith.mulf %169, %170 : vector<8x128xf32>
    %c0_44 = arith.constant 0 : index
    %c0_45 = arith.constant 0 : index
    %172 = vector.load %arg4[%c0_44, %c0_45] : memref<129x128xf32, #tpu.memory_space<vmem>>, vector<128x128xf32>
    %c128 = arith.constant 128 : index
    %c0_46 = arith.constant 0 : index
    %173 = vector.load %arg4[%c128, %c0_46] : memref<129x128xf32, #tpu.memory_space<vmem>>, vector<1x128xf32>
    %cst_47 = arith.constant dense<0.000000e+00> : vector<8x128xf32>
    %174 = tpu.matmul %171, %172, %cst_47 {dimension_numbers = #tpu.dot_dimension_numbers<[1], [0], [0], [1], [0, 0, 1, 1], [], []>} : vector<8x128xf32>, vector<128x128xf32>, vector<8x128xf32> -> vector<8x128xf32>
    %175 = vector.broadcast %173 : vector<1x128xf32> to vector<8x128xf32>
    %176 = arith.addf %174, %175 : vector<8x128xf32>
    %c0_48 = arith.constant 0 : index
    %c0_49 = arith.constant 0 : index
    %177 = vector.load %arg5[%c0_48, %c0_49] : memref<8x128xf32, #tpu.memory_space<vmem>>, vector<8x128xf32>
    tpu.vector_store %arg5[%c0_48, %c0_49], %176 {strides = array<i32>} : memref<8x128xf32, #tpu.memory_space<vmem>>, vector<8x128xf32>,
    return
  }
}

</mosaic_0001>

<bundles_post_ra>
// kernel: variational_forward.1
= control target key start
LH: loop header
LB: loop body
LE: loop exit
PB: predicated region body
PF: predicated region fallthrough
CT: control target
= control target key end

     0   :  { %10 = vsyncpa [#allocation3], 0  ;;  %s6269_s0 = inlined_call_operand.vmem [shape: f32[8,1280], index: 0, kind: input, shape index: {}]   ;;  %s6270_s1 = inlined_call_operand.hbm [shape: bf16[2048,512], index: 1, kind: input, shape index: {}]   ;;  %s6271_s2 = inlined_call_operand.vmem [shape: f32[920,32], index: 2, kind: input, shape index: {}]   ;;  %s6272_s3 = inlined_call_operand.hbm [shape: f32[56,512], index: 3, kind: input, shape index: {}]   ;;  %s6273_s4 = inlined_call_operand.hbm [shape: f32[129,128], index: 4, kind: input, shape index: {}]   ;;  %s6274_s5 = inlined_call_operand.vmem [shape: f32[8,128], index: 5, kind: output, shape index: {}]  }
   0x1   :  { %11 = vsyncpa [#allocation5], 0  ;;  %s5668_s18 = smov [#allocation4]   ;;  %s5598_s22 = scalar_lea.hbm %s6272_s3, 3584 }
   0x2   :  { %s33_s19 = sshll.u32 %s5668_s18, 4  ;;  %p5599_p0 = scmp.ne.s32.totalorder %s6272_s3, %s5598_s22  ;;  %s34_s19 = int_to_ptr.vmem [resolvable:$true] %s33_s19 }
   0x3   :  { %p5602_p1 = scmp.lt.u32.totalorder %s5598_s22, %s6272_s3 }
   0x5   :  { %p5604_p2 = pnand %p5602_p1, %p5599_p0 }
   0x7   :  { %5607 = shalt.err (!%p5604_p2)
}
   0x8   :  { %s5608_s27 = scalar_lea.vmem %s34_s19, 3584  ;;  %p5613_p4 = scmp.lt.s32.totalorder %s34_s19, %s34_s19 }
   0x9   :  { %p5609_p3 = scmp.ne.s32.totalorder %s34_s19, %s5608_s27  ;;  %p5614_p5 = scmp.lt.s32.totalorder %s5608_s27, %s5608_s27 }
   0xb   :  { %p5615_p6 = por %p5614_p5, %p5613_p4 }
   0xd   :  { %p5616_p7 = pnand %p5615_p6, %p5609_p3 }
   0xf   :  { %5619 = shalt.err (!%p5616_p7)
}
  0x10   :  { %s5669_s28 = smov 512   ;;  %s5670_s29 = smov 32  }
  0x11   :  { %39 = dma.hbm_to_vmem [thread:$0]  %s6272_s3, 3584, %s34_s19, [#allocation5], %s5669_s28, %s5669_s28, %s5670_s29  }
  0x12   :  { %s5671_s7 = smov [#allocation2]   ;;  %s5620_s11 = scalar_lea.hbm %s6270_s1, 65536 }
  0x13   :  { %s19_s8 = sshll.u32 %s5671_s7, 4  ;;  %p5621_p8 = scmp.ne.s32.totalorder %s6270_s1, %s5620_s11  ;;  %s20_s8 = int_to_ptr.vmem [resolvable:$true] %s19_s8 }
  0x14   :  { %p5624_p9 = scmp.lt.u32.totalorder %s5620_s11, %s6270_s1 }
  0x16   :  { %p5626_p10 = pnand %p5624_p9, %p5621_p8 }
  0x18   :  { %5629 = shalt.err (!%p5626_p10)
}
  0x19   :  { %s5630_s16 = scalar_lea.vmem %s20_s8, 65536  ;;  %p5635_p12 = scmp.lt.s32.totalorder %s20_s8, %s20_s8 }
  0x1a   :  { %p5631_p11 = scmp.ne.s32.totalorder %s20_s8, %s5630_s16  ;;  %p5636_p13 = scmp.lt.s32.totalorder %s5630_s16, %s5630_s16 }
  0x1c   :  { %p5637_p0 = por %p5636_p13, %p5635_p12 }
  0x1e   :  { %p5638_p1 = pnand %p5637_p0, %p5631_p11 }
  0x20   :  { %5641 = shalt.err (!%p5638_p1)
}
  0x21   :  { %s5672_s3 = smov 256   ;;  %s5673_s17 = smov 16  }
  0x22   :  { %25 = dma.hbm_to_vmem [thread:$0]  %s6270_s1, 65536, %s20_s8, [#allocation3], %s5672_s3, %s5672_s3, %s5673_s17  }
  0x23   :  { %s5674_s20 = smov [#allocation6]   ;;  %s5642_s24 = scalar_lea.hbm %s6273_s4, 2176 }
  0x24   :  { %s45_s21 = sshll.u32 %s5674_s20, 4  ;;  %p5643_p2 = scmp.ne.s32.totalorder %s6273_s4, %s5642_s24  ;;  %s46_s21 = int_to_ptr.vmem [resolvable:$true] %s45_s21 }
  0x25   :  { %p5646_p3 = scmp.lt.u32.totalorder %s5642_s24, %s6273_s4 }
  0x27   :  { %p5648_p4 = pnand %p5646_p3, %p5643_p2 }
  0x29   :  { %5651 = shalt.err (!%p5648_p4)
}
  0x2a   :  { %s5652_s29 = scalar_lea.vmem %s46_s21, 2176  ;;  %p5657_p6 = scmp.lt.s32.totalorder %s46_s21, %s46_s21 }
  0x2b   :  { %p5653_p5 = scmp.ne.s32.totalorder %s46_s21, %s5652_s29  ;;  %p5658_p7 = scmp.lt.s32.totalorder %s5652_s29, %s5652_s29 }
  0x2d   :  { %p5659_p8 = por %p5658_p7, %p5657_p6 }
  0x2f   :  { %p5660_p9 = pnand %p5659_p8, %p5653_p5 }
  0x31   :  { %5663 = shalt.err (!%p5660_p9)
}
  0x32   :  { %s5675_s1 = smov 128   ;;  %s5676_s30 = smov 8  }
  0x33   :  { %51 = dma.hbm_to_vmem [thread:$0]  %s6273_s4, 2176, %s46_s21, [#allocation5], %s5675_s1, %s5675_s1, %s5676_s30  }
  0x34   :  { %5664 = dma.done.wait [#allocation3], 65536  }
  0x35   :  { %5665 = vsyncadd [#allocation3], 4294901760 }
  0x36   :  { %5666 = dma.done.wait [#allocation5], 5760  }
  0x37   :  { %5667 = vsyncadd [#allocation5], 4294961536  ;;  %v5000_v0 = vld [vmem:[#allocation2 + $0x4] ss:$16 sps:$4 sm:$0xff]   ;;  %v5002_v1 = vld [vmem:[#allocation2 + $0xc] ss:$16 sps:$4 sm:$0xff]  }
  0x38   :  { %2011 = vmatprep.subr.bf16.mxu0 %v5000_v0  ;;  %v5004_v2 = vld [vmem:[#allocation2] ss:$16 sps:$4 sm:$0xff]   ;;  %v5005_v3 = vld [vmem:[#allocation2 + $0x8] ss:$16 sps:$4 sm:$0xff]   ;;  %2216 = vmatprep.subr.bf16.mxu1 %v5002_v1  ;;  %v5006_v4 = vld [vmem:[#allocation2 + $0x24] ss:$16 sps:$4 sm:$0xff]  }
  0x39   :  { %2012 = vmatpush1.bf16.msra.mxu0 %v5004_v2  ;;  %2217 = vmatpush1.bf16.msra.mxu1 %v5005_v3  ;;  %v5008_v5 = vld [vmem:[#allocation2 + $0x2c] ss:$16 sps:$4 sm:$0xff]   ;;  %v5010_v6 = vld [vmem:[#allocation2 + $0x20] ss:$16 sps:$4 sm:$0xff]   ;;  %v5011_v7 = vld [vmem:[#allocation2 + $0x28] ss:$16 sps:$4 sm:$0xff]  }
  0x3a   :  { %2013 = vmatprep.subr.bf16.mxu0 %v5006_v4  ;;  %2218 = vmatprep.subr.bf16.mxu1 %v5008_v5  ;;  %v5012_v8 = vld [vmem:[#allocation2 + $0x44] ss:$16 sps:$4 sm:$0xff]   ;;  %v5014_v9 = vld [vmem:[#allocation2 + $0x4c] ss:$16 sps:$4 sm:$0xff]   ;;  %v5016_v10 = vld [vmem:[#allocation2 + $0x40] ss:$16 sps:$4 sm:$0xff]  }
  0x3b   :  { %v5017_v11 = vld [vmem:[#allocation2 + $0x48] ss:$16 sps:$4 sm:$0xff]   ;;  %v5018_v12 = vld [vmem:[#allocation2 + $0x64] ss:$16 sps:$4 sm:$0xff]   ;;  %v5020_v13 = vld [vmem:[#allocation2 + $0x6c] ss:$16 sps:$4 sm:$0xff]  }
  0x3c   :  { %v5022_v14 = vld [vmem:[#allocation2 + $0x60] ss:$16 sps:$4 sm:$0xff]   ;;  %v5023_v15 = vld [vmem:[#allocation2 + $0x68] ss:$16 sps:$4 sm:$0xff]   ;;  %v5024_v16 = vld [vmem:[#allocation2 + $0x84] ss:$16 sps:$4 sm:$0xff]  }
  0x3d   :  { %2014 = vmatpush1.bf16.msra.mxu0 %v5010_v6  ;;  %2219 = vmatpush1.bf16.msra.mxu1 %v5011_v7  ;;  %v5026_v17 = vld [vmem:[#allocation2 + $0x8c] ss:$16 sps:$4 sm:$0xff]   ;;  %v5028_v18 = vld [vmem:[#allocation2 + $0x80] ss:$16 sps:$4 sm:$0xff]   ;;  %v5029_v19 = vld [vmem:[#allocation2 + $0x88] ss:$16 sps:$4 sm:$0xff]  }
  0x3e   :  { %2015 = vmatprep.subr.bf16.mxu0 %v5012_v8  ;;  %2220 = vmatprep.subr.bf16.mxu1 %v5014_v9  ;;  %v5030_v20 = vld [vmem:[#allocation2 + $0xa4] ss:$16 sps:$4 sm:$0xff]   ;;  %v5032_v21 = vld [vmem:[#allocation2 + $0xac] ss:$16 sps:$4 sm:$0xff]   ;;  %v5034_v22 = vld [vmem:[#allocation2 + $0xa0] ss:$16 sps:$4 sm:$0xff]  }
  0x3f   :  { %v5035_v23 = vld [vmem:[#allocation2 + $0xa8] ss:$16 sps:$4 sm:$0xff]   ;;  %v5036_v24 = vld [vmem:[#allocation2 + $0xc4] ss:$16 sps:$4 sm:$0xff]   ;;  %v5038_v25 = vld [vmem:[#allocation2 + $0xcc] ss:$16 sps:$4 sm:$0xff]  }
  0x40   :  { %v5040_v26 = vld [vmem:[#allocation2 + $0xc0] ss:$16 sps:$4 sm:$0xff]   ;;  %v5041_v27 = vld [vmem:[#allocation2 + $0xc8] ss:$16 sps:$4 sm:$0xff]   ;;  %v5042_v28 = vld [vmem:[#allocation2 + $0xe4] ss:$16 sps:$4 sm:$0xff]  }
  0x41   :  { %2016 = vmatpush1.bf16.msra.mxu0 %v5016_v10  ;;  %2221 = vmatpush1.bf16.msra.mxu1 %v5017_v11  ;;  %v5044_v29 = vld [vmem:[#allocation2 + $0xec] ss:$16 sps:$4 sm:$0xff]   ;;  %v5046_v30 = vld [vmem:[#allocation2 + $0xe0] ss:$16 sps:$4 sm:$0xff]   ;;  %v5047_v31 = vld [vmem:[#allocation2 + $0xe8] ss:$16 sps:$4 sm:$0xff]  }
  0x42   :  { %2017 = vmatprep.subr.bf16.mxu0 %v5018_v12  ;;  %2222 = vmatprep.subr.bf16.mxu1 %v5020_v13  ;;  %v5048_v32 = vld [vmem:[#allocation2 + $0x104] ss:$16 sps:$4 sm:$0xff]   ;;  %v5050_v33 = vld [vmem:[#allocation2 + $0x10c] ss:$16 sps:$4 sm:$0xff]   ;;  %v5052_v34 = vld [vmem:[#allocation2 + $0x100] ss:$16 sps:$4 sm:$0xff]  }
  0x43   :  { %v5053_v35 = vld [vmem:[#allocation2 + $0x108] ss:$16 sps:$4 sm:$0xff]   ;;  %v5054_v36 = vld [vmem:[#allocation2 + $0x124] ss:$16 sps:$4 sm:$0xff]   ;;  %v5056_v37 = vld [vmem:[#allocation2 + $0x12c] ss:$16 sps:$4 sm:$0xff]  }
  0x44   :  { %v5058_v38 = vld [vmem:[#allocation2 + $0x120] ss:$16 sps:$4 sm:$0xff]   ;;  %v5059_v39 = vld [vmem:[#allocation2 + $0x128] ss:$16 sps:$4 sm:$0xff]   ;;  %v5060_v40 = vld [vmem:[#allocation2 + $0x144] ss:$16 sps:$4 sm:$0xff]  }
  0x45   :  { %2018 = vmatpush1.bf16.msra.mxu0 %v5022_v14  ;;  %2223 = vmatpush1.bf16.msra.mxu1 %v5023_v15  ;;  %v5062_v41 = vld [vmem:[#allocation2 + $0x14c] ss:$16 sps:$4 sm:$0xff]   ;;  %v5064_v42 = vld [vmem:[#allocation2 + $0x140] ss:$16 sps:$4 sm:$0xff]   ;;  %v5065_v43 = vld [vmem:[#allocation2 + $0x148] ss:$16 sps:$4 sm:$0xff]  }
  0x46   :  { %2019 = vmatprep.subr.bf16.mxu0 %v5024_v16  ;;  %2224 = vmatprep.subr.bf16.mxu1 %v5026_v17  ;;  %v5066_v44 = vld [vmem:[#allocation2 + $0x164] ss:$16 sps:$4 sm:$0xff]   ;;  %v5068_v45 = vld [vmem:[#allocation2 + $0x16c] ss:$16 sps:$4 sm:$0xff]   ;;  %v5070_v47 = vld [vmem:[#allocation2 + $0x160] ss:$16 sps:$4 sm:$0xff]  }
  0x47   :  { %v72_v46 = vld [vmem:[%s6269_s0 + $0x8] sm:$0xff]  ;;  %v5072_v50 = vld [vmem:[#allocation2 + $0x184] ss:$16 sps:$4 sm:$0xff]   ;;  %v5076_v52 = vld [vmem:[#allocation2 + $0x180] ss:$16 sps:$4 sm:$0xff]   ;;  %vm2723_vm1 = vcmask 64512  }
  0x48   :  { %v402_v48 = vpack.c.bf16 %v72_v46, %v72_v46  ;;  %v5071_v49 = vld [vmem:[#allocation2 + $0x168] ss:$16 sps:$4 sm:$0xff]   ;;  %v5074_v51 = vld [vmem:[#allocation2 + $0x18c] ss:$16 sps:$4 sm:$0xff]   ;;  %v5078_v54 = vld [vmem:[#allocation2 + $0x1a4] ss:$16 sps:$4 sm:$0xff]  }
  0x49   :  { %2020 = vmatpush1.bf16.msra.mxu0 %v5028_v18  ;;  %2225 = vmatpush1.bf16.msra.mxu1 %v5029_v19  ;;  %v5077_v53 = vld [vmem:[#allocation2 + $0x188] ss:$16 sps:$4 sm:$0xff]   ;;  %v5080_v55 = vld [vmem:[#allocation2 + $0x1ac] ss:$16 sps:$4 sm:$0xff]   ;;  %v5082_v56 = vld [vmem:[#allocation2 + $0x1a0] ss:$16 sps:$4 sm:$0xff]  }
  0x4a   :  { %2021 = vmatprep.subr.bf16.mxu0 %v5030_v20  ;;  %2226 = vmatprep.subr.bf16.mxu1 %v5032_v21  ;;  %v5083_v57 = vld [vmem:[#allocation2 + $0x1a8] ss:$16 sps:$4 sm:$0xff]   ;;  %v5084_v58 = vld [vmem:[#allocation2 + $0x1c4] ss:$16 sps:$4 sm:$0xff]   ;;  %v5086_v59 = vld [vmem:[#allocation2 + $0x1cc] ss:$16 sps:$4 sm:$0xff]  }
  0x4b   :  { %2043 = vmatprep.mubr.bf16.mxu0 %v402_v48  ;;  %2248 = vmatprep.mubr.bf16.mxu1 %v402_v48  ;;  %v5088_v60 = vld [vmem:[#allocation2 + $0x1c0] ss:$16 sps:$4 sm:$0xff]   ;;  %v5089_v61 = vld [vmem:[#allocation2 + $0x1c8] ss:$16 sps:$4 sm:$0xff]   ;;  %v5090_v62 = vld [vmem:[#allocation2 + $0x1e4] ss:$16 sps:$4 sm:$0xff]  }
  0x4c   :  { %v5092_v63 = vld [vmem:[#allocation2 + $0x1ec] ss:$16 sps:$4 sm:$0xff]   ;;  %v5094_v0 = vld [vmem:[#allocation2 + $0x1e0] ss:$16 sps:$4 sm:$0xff]   ;;  %v5095_v1 = vld [vmem:[#allocation2 + $0x1e8] ss:$16 sps:$4 sm:$0xff]  }
  0x4d   :  { %2022 = vmatpush1.bf16.msra.mxu0 %v5034_v22  ;;  %2227 = vmatpush1.bf16.msra.mxu1 %v5035_v23  ;;  %v71_v2 = vld [vmem:[%s6269_s0] sm:$0xff]  ;;  %v5101_v4 = vld [vmem:[#allocation2 + $0x20c] ss:$16 sps:$4 sm:$0xff]   ;;  %v5099_v7 = vld [vmem:[#allocation2 + $0x208] ss:$16 sps:$4 sm:$0xff]   ;;  %vm3555_vm3 = vcmask 130048  }
  0x4e   :  { %2023 = vmatprep.subr.bf16.mxu0 %v5036_v24  ;;  %2228 = vmatprep.subr.bf16.mxu1 %v5038_v25  ;;  %v5098_v3 = vld [vmem:[#allocation2 + $0x204] ss:$16 sps:$4 sm:$0xff]   ;;  %v401_v5 = vpack.c.bf16 %v71_v2, %v71_v2  ;;  %v5096_v6 = vld [vmem:[#allocation2 + $0x200] ss:$16 sps:$4 sm:$0xff]   ;;  %v5107_v9 = vld [vmem:[#allocation2 + $0x22c] ss:$16 sps:$4 sm:$0xff]  }
  0x4f   :  { %v5104_v8 = vld [vmem:[#allocation2 + $0x224] ss:$16 sps:$4 sm:$0xff]   ;;  %v5102_v10 = vld [vmem:[#allocation2 + $0x220] ss:$16 sps:$4 sm:$0xff]   ;;  %v5105_v11 = vld [vmem:[#allocation2 + $0x228] ss:$16 sps:$4 sm:$0xff]  }
  0x50   :  { %v5110_v12 = vld [vmem:[#allocation2 + $0x244] ss:$16 sps:$4 sm:$0xff]   ;;  %v5113_v13 = vld [vmem:[#allocation2 + $0x24c] ss:$16 sps:$4 sm:$0xff]   ;;  %v5108_v14 = vld [vmem:[#allocation2 + $0x240] ss:$16 sps:$4 sm:$0xff]  }
  0x51   :  { %2024 = vmatpush1.bf16.msra.mxu0 %v5040_v26  ;;  %2229 = vmatpush1.bf16.msra.mxu1 %v5041_v27  ;;  %v5111_v15 = vld [vmem:[#allocation2 + $0x248] ss:$16 sps:$4 sm:$0xff]   ;;  %v5116_v16 = vld [vmem:[#allocation2 + $0x264] ss:$16 sps:$4 sm:$0xff]   ;;  %v5119_v17 = vld [vmem:[#allocation2 + $0x26c] ss:$16 sps:$4 sm:$0xff]  }
  0x52   :  { %2025 = vmatprep.subr.bf16.mxu0 %v5042_v28  ;;  %2230 = vmatprep.subr.bf16.mxu1 %v5044_v29  ;;  %v5114_v18 = vld [vmem:[#allocation2 + $0x260] ss:$16 sps:$4 sm:$0xff]   ;;  %v5117_v19 = vld [vmem:[#allocation2 + $0x268] ss:$16 sps:$4 sm:$0xff]   ;;  %v5122_v20 = vld [vmem:[#allocation2 + $0x284] ss:$16 sps:$4 sm:$0xff]  }
  0x53   :  { %v5125_v21 = vld [vmem:[#allocation2 + $0x28c] ss:$16 sps:$4 sm:$0xff]   ;;  %v5120_v22 = vld [vmem:[#allocation2 + $0x280] ss:$16 sps:$4 sm:$0xff]   ;;  %v5123_v23 = vld [vmem:[#allocation2 + $0x288] ss:$16 sps:$4 sm:$0xff]  }
  0x54   :  { %v5128_v24 = vld [vmem:[#allocation2 + $0x2a4] ss:$16 sps:$4 sm:$0xff]   ;;  %v5131_v25 = vld [vmem:[#allocation2 + $0x2ac] ss:$16 sps:$4 sm:$0xff]   ;;  %v5126_v26 = vld [vmem:[#allocation2 + $0x2a0] ss:$16 sps:$4 sm:$0xff]  }
  0x55   :  { %2026 = vmatpush1.bf16.msra.mxu0 %v5046_v30  ;;  %2231 = vmatpush1.bf16.msra.mxu1 %v5047_v31  ;;  %v5129_v27 = vld [vmem:[#allocation2 + $0x2a8] ss:$16 sps:$4 sm:$0xff]   ;;  %v5134_v28 = vld [vmem:[#allocation2 + $0x2c4] ss:$16 sps:$4 sm:$0xff]   ;;  %v5137_v29 = vld [vmem:[#allocation2 + $0x2cc] ss:$16 sps:$4 sm:$0xff]  }
  0x56   :  { %2027 = vmatprep.subr.bf16.mxu0 %v5048_v32  ;;  %2232 = vmatprep.subr.bf16.mxu1 %v5050_v33  ;;  %v74_v30 = vld [vmem:[%s6269_s0 + $0x18] sm:$0xff]  ;;  %v5132_v31 = vld [vmem:[#allocation2 + $0x2c0] ss:$16 sps:$4 sm:$0xff]   ;;  %v5158_v46 = vld [vmem:[#allocation2 + $0x344] ss:$16 sps:$4 sm:$0xff]   ;;  %vm5679_vm4 = vmmov 0  }
  0x57   :  { %v404_v32 = vpack.c.bf16 %v74_v30, %v74_v30  ;;  %v5135_v33 = vld [vmem:[#allocation2 + $0x2c8] ss:$16 sps:$4 sm:$0xff]   ;;  %v5156_v48 = vld [vmem:[#allocation2 + $0x340] ss:$16 sps:$4 sm:$0xff]   ;;  %v5188_v2 = vld [vmem:[#allocation2 + $0x3e4] ss:$16 sps:$4 sm:$0xff]  }
  0x58   :  { %v5224_v30 = vld [vmem:[#allocation2 + $0x4a4] ss:$16 sps:$4 sm:$0xff]   ;;  %vm3960_vm5 = vcmask 261120  }
  0x59   :  { %2028 = vmatpush1.bf16.msra.mxu0 %v5052_v34  ;;  %2233 = vmatpush1.bf16.msra.mxu1 %v5053_v35  ;;  %v5140_v34 = vld [vmem:[#allocation2 + $0x2e4] ss:$16 sps:$4 sm:$0xff]   ;;  %v5143_v35 = vld [vmem:[#allocation2 + $0x2ec] ss:$16 sps:$4 sm:$0xff]  }
  0x5a   :  { %2029 = vmatprep.subr.bf16.mxu0 %v5054_v36  ;;  %2234 = vmatprep.subr.bf16.mxu1 %v5056_v37  ;;  %v5138_v36 = vld [vmem:[#allocation2 + $0x2e0] ss:$16 sps:$4 sm:$0xff]   ;;  %v5141_v37 = vld [vmem:[#allocation2 + $0x2e8] ss:$16 sps:$4 sm:$0xff]  }
  0x5d   :  { %2030 = vmatpush1.bf16.msra.mxu0 %v5058_v38  ;;  %2235 = vmatpush1.bf16.msra.mxu1 %v5059_v39  ;;  %v5146_v38 = vld [vmem:[#allocation2 + $0x304] ss:$16 sps:$4 sm:$0xff]   ;;  %v5149_v39 = vld [vmem:[#allocation2 + $0x30c] ss:$16 sps:$4 sm:$0xff]  }
  0x5e   :  { %2031 = vmatprep.subr.bf16.mxu0 %v5060_v40  ;;  %2236 = vmatprep.subr.bf16.mxu1 %v5062_v41  ;;  %v5144_v40 = vld [vmem:[#allocation2 + $0x300] ss:$16 sps:$4 sm:$0xff]   ;;  %v5147_v41 = vld [vmem:[#allocation2 + $0x308] ss:$16 sps:$4 sm:$0xff]  }
  0x61   :  { %2032 = vmatpush1.bf16.msra.mxu0 %v5064_v42  ;;  %2237 = vmatpush1.bf16.msra.mxu1 %v5065_v43  ;;  %v5152_v42 = vld [vmem:[#allocation2 + $0x324] ss:$16 sps:$4 sm:$0xff]   ;;  %v5155_v43 = vld [vmem:[#allocation2 + $0x32c] ss:$16 sps:$4 sm:$0xff]  }
  0x62   :  { %2033 = vmatprep.subr.bf16.mxu0 %v5066_v44  ;;  %2238 = vmatprep.subr.bf16.mxu1 %v5068_v45  ;;  %v5150_v44 = vld [vmem:[#allocation2 + $0x320] ss:$16 sps:$4 sm:$0xff]   ;;  %v5153_v45 = vld [vmem:[#allocation2 + $0x328] ss:$16 sps:$4 sm:$0xff]  }
  0x65   :  { %2034 = vmatpush1.bf16.msra.mxu0 %v5070_v47  ;;  %2239 = vmatpush1.bf16.msra.mxu1 %v5071_v49  ;;  %v5161_v47 = vld [vmem:[#allocation2 + $0x34c] ss:$16 sps:$4 sm:$0xff]   ;;  %v5159_v49 = vld [vmem:[#allocation2 + $0x348] ss:$16 sps:$4 sm:$0xff]  }
  0x66   :  { %2035 = vmatprep.subr.bf16.mxu0 %v5072_v50  ;;  %2240 = vmatprep.subr.bf16.mxu1 %v5074_v51  ;;  %v5164_v50 = vld [vmem:[#allocation2 + $0x364] ss:$16 sps:$4 sm:$0xff]   ;;  %v5167_v51 = vld [vmem:[#allocation2 + $0x36c] ss:$16 sps:$4 sm:$0xff]  }
  0x69   :  { %2036 = vmatpush1.bf16.msra.mxu0 %v5076_v52  ;;  %2241 = vmatpush1.bf16.msra.mxu1 %v5077_v53  ;;  %v5162_v52 = vld [vmem:[#allocation2 + $0x360] ss:$16 sps:$4 sm:$0xff]   ;;  %v5165_v53 = vld [vmem:[#allocation2 + $0x368] ss:$16 sps:$4 sm:$0xff]  }
  0x6a   :  { %2037 = vmatprep.subr.bf16.mxu0 %v5078_v54  ;;  %2242 = vmatprep.subr.bf16.mxu1 %v5080_v55  ;;  %v5170_v54 = vld [vmem:[#allocation2 + $0x384] ss:$16 sps:$4 sm:$0xff]   ;;  %v5173_v55 = vld [vmem:[#allocation2 + $0x38c] ss:$16 sps:$4 sm:$0xff]  }
  0x6d   :  { %2038 = vmatpush1.bf16.msra.mxu0 %v5082_v56  ;;  %2243 = vmatpush1.bf16.msra.mxu1 %v5083_v57  ;;  %v5168_v56 = vld [vmem:[#allocation2 + $0x380] ss:$16 sps:$4 sm:$0xff]   ;;  %v5171_v57 = vld [vmem:[#allocation2 + $0x388] ss:$16 sps:$4 sm:$0xff]  }
  0x6e   :  { %2039 = vmatprep.subr.bf16.mxu0 %v5084_v58  ;;  %2244 = vmatprep.subr.bf16.mxu1 %v5086_v59  ;;  %v5176_v58 = vld [vmem:[#allocation2 + $0x3a4] ss:$16 sps:$4 sm:$0xff]   ;;  %v5179_v59 = vld [vmem:[#allocation2 + $0x3ac] ss:$16 sps:$4 sm:$0xff]  }
  0x71   :  { %2040 = vmatpush1.bf16.msra.mxu0 %v5088_v60  ;;  %2245 = vmatpush1.bf16.msra.mxu1 %v5089_v61  ;;  %v5174_v60 = vld [vmem:[#allocation2 + $0x3a0] ss:$16 sps:$4 sm:$0xff]   ;;  %v5177_v61 = vld [vmem:[#allocation2 + $0x3a8] ss:$16 sps:$4 sm:$0xff]  }
  0x72   :  { %2041 = vmatprep.subr.bf16.mxu0 %v5090_v62  ;;  %2246 = vmatprep.subr.bf16.mxu1 %v5092_v63  ;;  %v5182_v62 = vld [vmem:[#allocation2 + $0x3c4] ss:$16 sps:$4 sm:$0xff]   ;;  %v5185_v63 = vld [vmem:[#allocation2 + $0x3cc] ss:$16 sps:$4 sm:$0xff]  }
  0x75   :  { %2042 = vmatpush1.bf16.msra.mxu0 %v5094_v0  ;;  %2247 = vmatpush1.bf16.msra.mxu1 %v5095_v1  ;;  %v5180_v0 = vld [vmem:[#allocation2 + $0x3c0] ss:$16 sps:$4 sm:$0xff]   ;;  %v5183_v1 = vld [vmem:[#allocation2 + $0x3c8] ss:$16 sps:$4 sm:$0xff]  }
  0x76   :  { %2052 = vmatprep.subr.bf16.mxu0 %v5098_v3  ;;  %2257 = vmatprep.subr.bf16.mxu1 %v5101_v4  ;;  %v5191_v3 = vld [vmem:[#allocation2 + $0x3ec] ss:$16 sps:$4 sm:$0xff]   ;;  %v5186_v4 = vld [vmem:[#allocation2 + $0x3e0] ss:$16 sps:$4 sm:$0xff]  }
  0x78   :  { %2044 = vmatmul.mubr.bf16.vlgmr.msra.gmra.mrb[0].mxu0 %v401_v5  ;;  %2249 = vmatmul.mubr.bf16.vlgmr.msra.gmra.mrb[0].mxu1 %v401_v5  ;;  %v5189_v5 = vld [vmem:[#allocation2 + $0x3e8] ss:$16 sps:$4 sm:$0xff]  }
  0x79   :  { %2053 = vmatpush1.bf16.msra.mxu0 %v5096_v6  ;;  %2258 = vmatpush1.bf16.msra.mxu1 %v5099_v7  ;;  %v5194_v6 = vld [vmem:[#allocation2 + $0x404] ss:$16 sps:$4 sm:$0xff]  }
  0x7a   :  { %2054 = vmatprep.subr.bf16.mxu0 %v5104_v8  ;;  %2259 = vmatprep.subr.bf16.mxu1 %v5107_v9  ;;  %v73_v7 = vld [vmem:[%s6269_s0 + $0x10] sm:$0xff]  ;;  %v5197_v8 = vld [vmem:[#allocation2 + $0x40c] ss:$16 sps:$4 sm:$0xff]  }
  0x7b   :  { %2084 = vmatprep.mubr.bf16.mxu0 %v404_v32  ;;  %2289 = vmatprep.mubr.bf16.mxu1 %v404_v32  ;;  %v5192_v9 = vld [vmem:[#allocation2 + $0x400] ss:$16 sps:$4 sm:$0xff]  }
  0x7c   :  { %v5222_v32 = vld [vmem:[#allocation2 + $0x4a0] ss:$16 sps:$4 sm:$0xff]  }
  0x7d   :  { %2055 = vmatpush1.bf16.msra.mxu0 %v5102_v10  ;;  %2260 = vmatpush1.bf16.msra.mxu1 %v5105_v11  ;;  %v5195_v10 = vld [vmem:[#allocation2 + $0x408] ss:$16 sps:$4 sm:$0xff]   ;;  %v403_v11 = vpack.c.bf16 %v73_v7, %v73_v7  ;;  %v5287_v7 = vld [vmem:[#allocation2 + $0x5ec] ss:$16 sps:$4 sm:$0xff]  }
  0x7e   :  { %2056 = vmatprep.subr.bf16.mxu0 %v5110_v12  ;;  %2261 = vmatprep.subr.bf16.mxu1 %v5113_v13  ;;  %v5200_v12 = vld [vmem:[#allocation2 + $0x424] ss:$16 sps:$4 sm:$0xff]   ;;  %v5203_v13 = vld [vmem:[#allocation2 + $0x42c] ss:$16 sps:$4 sm:$0xff]  }
  0x81   :  { %2057 = vmatpush1.bf16.msra.mxu0 %v5108_v14  ;;  %2262 = vmatpush1.bf16.msra.mxu1 %v5111_v15  ;;  %v76_v14 = vld [vmem:[%s6269_s0 + $0x28] sm:$0xff] }
  0x82   :  { %2058 = vmatprep.subr.bf16.mxu0 %v5116_v16  ;;  %2263 = vmatprep.subr.bf16.mxu1 %v5119_v17  ;;  %v406_v15 = vpack.c.bf16 %v76_v14, %v76_v14  ;;  %v5198_v16 = vld [vmem:[#allocation2 + $0x420] ss:$16 sps:$4 sm:$0xff]   ;;  %v5201_v17 = vld [vmem:[#allocation2 + $0x428] ss:$16 sps:$4 sm:$0xff]  }
  0x83   :  { %v5291_v14 = vld [vmem:[#allocation2 + $0x608] ss:$16 sps:$4 sm:$0xff]  }
  0x85   :  { %2059 = vmatpush1.bf16.msra.mxu0 %v5114_v18  ;;  %2264 = vmatpush1.bf16.msra.mxu1 %v5117_v19  ;;  %v5206_v18 = vld [vmem:[#allocation2 + $0x444] ss:$16 sps:$4 sm:$0xff]   ;;  %v5209_v19 = vld [vmem:[#allocation2 + $0x44c] ss:$16 sps:$4 sm:$0xff]  }
  0x86   :  { %2060 = vmatprep.subr.bf16.mxu0 %v5122_v20  ;;  %2265 = vmatprep.subr.bf16.mxu1 %v5125_v21  ;;  %v5204_v20 = vld [vmem:[#allocation2 + $0x440] ss:$16 sps:$4 sm:$0xff]   ;;  %v5207_v21 = vld [vmem:[#allocation2 + $0x448] ss:$16 sps:$4 sm:$0xff]  }
  0x89   :  { %2061 = vmatpush1.bf16.msra.mxu0 %v5120_v22  ;;  %2266 = vmatpush1.bf16.msra.mxu1 %v5123_v23  ;;  %v5212_v22 = vld [vmem:[#allocation2 + $0x464] ss:$16 sps:$4 sm:$0xff]   ;;  %v5215_v23 = vld [vmem:[#allocation2 + $0x46c] ss:$16 sps:$4 sm:$0xff]  }
  0x8a   :  { %2062 = vmatprep.subr.bf16.mxu0 %v5128_v24  ;;  %2267 = vmatprep.subr.bf16.mxu1 %v5131_v25  ;;  %v5210_v24 = vld [vmem:[#allocation2 + $0x460] ss:$16 sps:$4 sm:$0xff]   ;;  %v5213_v25 = vld [vmem:[#allocation2 + $0x468] ss:$16 sps:$4 sm:$0xff]  }
  0x8d   :  { %2063 = vmatpush1.bf16.msra.mxu0 %v5126_v26  ;;  %2268 = vmatpush1.bf16.msra.mxu1 %v5129_v27  ;;  %v5218_v26 = vld [vmem:[#allocation2 + $0x484] ss:$16 sps:$4 sm:$0xff]   ;;  %v5221_v27 = vld [vmem:[#allocation2 + $0x48c] ss:$16 sps:$4 sm:$0xff]  }
  0x8e   :  { %2064 = vmatprep.subr.bf16.mxu0 %v5134_v28  ;;  %2269 = vmatprep.subr.bf16.mxu1 %v5137_v29  ;;  %v5216_v28 = vld [vmem:[#allocation2 + $0x480] ss:$16 sps:$4 sm:$0xff]   ;;  %v5219_v29 = vld [vmem:[#allocation2 + $0x488] ss:$16 sps:$4 sm:$0xff]  }
  0x91   :  { %2065 = vmatpush1.bf16.msra.mxu0 %v5132_v31  ;;  %2270 = vmatpush1.bf16.msra.mxu1 %v5135_v33  ;;  %v5227_v31 = vld [vmem:[#allocation2 + $0x4ac] ss:$16 sps:$4 sm:$0xff]   ;;  %v5225_v33 = vld [vmem:[#allocation2 + $0x4a8] ss:$16 sps:$4 sm:$0xff]  }
  0x92   :  { %2066 = vmatprep.subr.bf16.mxu0 %v5140_v34  ;;  %2271 = vmatprep.subr.bf16.mxu1 %v5143_v35  ;;  %v5230_v34 = vld [vmem:[#allocation2 + $0x4c4] ss:$16 sps:$4 sm:$0xff]   ;;  %v5233_v35 = vld [vmem:[#allocation2 + $0x4cc] ss:$16 sps:$4 sm:$0xff]  }
  0x95   :  { %2067 = vmatpush1.bf16.msra.mxu0 %v5138_v36  ;;  %2272 = vmatpush1.bf16.msra.mxu1 %v5141_v37  ;;  %v5228_v36 = vld [vmem:[#allocation2 + $0x4c0] ss:$16 sps:$4 sm:$0xff]   ;;  %v5231_v37 = vld [vmem:[#allocation2 + $0x4c8] ss:$16 sps:$4 sm:$0xff]  }
  0x96   :  { %2068 = vmatprep.subr.bf16.mxu0 %v5146_v38  ;;  %2273 = vmatprep.subr.bf16.mxu1 %v5149_v39  ;;  %v5236_v38 = vld [vmem:[#allocation2 + $0x4e4] ss:$16 sps:$4 sm:$0xff]   ;;  %v5239_v39 = vld [vmem:[#allocation2 + $0x4ec] ss:$16 sps:$4 sm:$0xff]  }
  0x99   :  { %2069 = vmatpush1.bf16.msra.mxu0 %v5144_v40  ;;  %2274 = vmatpush1.bf16.msra.mxu1 %v5147_v41  ;;  %v5234_v40 = vld [vmem:[#allocation2 + $0x4e0] ss:$16 sps:$4 sm:$0xff]   ;;  %v5237_v41 = vld [vmem:[#allocation2 + $0x4e8] ss:$16 sps:$4 sm:$0xff]  }
  0x9a   :  { %2070 = vmatprep.subr.bf16.mxu0 %v5152_v42  ;;  %2275 = vmatprep.subr.bf16.mxu1 %v5155_v43  ;;  %v5242_v42 = vld [vmem:[#allocation2 + $0x504] ss:$16 sps:$4 sm:$0xff]   ;;  %v5245_v43 = vld [vmem:[#allocation2 + $0x50c] ss:$16 sps:$4 sm:$0xff]  }
  0x9d   :  { %2071 = vmatpush1.bf16.msra.mxu0 %v5150_v44  ;;  %2276 = vmatpush1.bf16.msra.mxu1 %v5153_v45  ;;  %v5240_v44 = vld [vmem:[#allocation2 + $0x500] ss:$16 sps:$4 sm:$0xff]   ;;  %v5243_v45 = vld [vmem:[#allocation2 + $0x508] ss:$16 sps:$4 sm:$0xff]  }
  0x9e   :  { %2072 = vmatprep.subr.bf16.mxu0 %v5158_v46  ;;  %2277 = vmatprep.subr.bf16.mxu1 %v5161_v47  ;;  %v5248_v46 = vld [vmem:[#allocation2 + $0x524] ss:$16 sps:$4 sm:$0xff]   ;;  %v5251_v47 = vld [vmem:[#allocation2 + $0x52c] ss:$16 sps:$4 sm:$0xff]  }
  0xa1   :  { %2073 = vmatpush1.bf16.msra.mxu0 %v5156_v48  ;;  %2278 = vmatpush1.bf16.msra.mxu1 %v5159_v49  ;;  %v5246_v48 = vld [vmem:[#allocation2 + $0x520] ss:$16 sps:$4 sm:$0xff]   ;;  %v5249_v49 = vld [vmem:[#allocation2 + $0x528] ss:$16 sps:$4 sm:$0xff]  }
  0xa2   :  { %2074 = vmatprep.subr.bf16.mxu0 %v5164_v50  ;;  %2279 = vmatprep.subr.bf16.mxu1 %v5167_v51  ;;  %v5254_v50 = vld [vmem:[#allocation2 + $0x544] ss:$16 sps:$4 sm:$0xff]   ;;  %v5257_v51 = vld [vmem:[#allocation2 + $0x54c] ss:$16 sps:$4 sm:$0xff]  }
  0xa5   :  { %2075 = vmatpush1.bf16.msra.mxu0 %v5162_v52  ;;  %2280 = vmatpush1.bf16.msra.mxu1 %v5165_v53  ;;  %v5252_v52 = vld [vmem:[#allocation2 + $0x540] ss:$16 sps:$4 sm:$0xff]   ;;  %v5255_v53 = vld [vmem:[#allocation2 + $0x548] ss:$16 sps:$4 sm:$0xff]  }
  0xa6   :  { %2076 = vmatprep.subr.bf16.mxu0 %v5170_v54  ;;  %2281 = vmatprep.subr.bf16.mxu1 %v5173_v55  ;;  %v5260_v54 = vld [vmem:[#allocation2 + $0x564] ss:$16 sps:$4 sm:$0xff]   ;;  %v5263_v55 = vld [vmem:[#allocation2 + $0x56c] ss:$16 sps:$4 sm:$0xff]  }
  0xa9   :  { %2077 = vmatpush1.bf16.msra.mxu0 %v5168_v56  ;;  %2282 = vmatpush1.bf16.msra.mxu1 %v5171_v57  ;;  %v5258_v56 = vld [vmem:[#allocation2 + $0x560] ss:$16 sps:$4 sm:$0xff]   ;;  %v5261_v57 = vld [vmem:[#allocation2 + $0x568] ss:$16 sps:$4 sm:$0xff]  }
  0xaa   :  { %2078 = vmatprep.subr.bf16.mxu0 %v5176_v58  ;;  %2283 = vmatprep.subr.bf16.mxu1 %v5179_v59  ;;  %v5266_v58 = vld [vmem:[#allocation2 + $0x584] ss:$16 sps:$4 sm:$0xff]   ;;  %v5269_v59 = vld [vmem:[#allocation2 + $0x58c] ss:$16 sps:$4 sm:$0xff]  }
  0xad   :  { %2079 = vmatpush1.bf16.msra.mxu0 %v5174_v60  ;;  %2284 = vmatpush1.bf16.msra.mxu1 %v5177_v61  ;;  %v5264_v60 = vld [vmem:[#allocation2 + $0x580] ss:$16 sps:$4 sm:$0xff]   ;;  %v5267_v61 = vld [vmem:[#allocation2 + $0x588] ss:$16 sps:$4 sm:$0xff]  }
  0xae   :  { %2080 = vmatprep.subr.bf16.mxu0 %v5182_v62  ;;  %2285 = vmatprep.subr.bf16.mxu1 %v5185_v63  ;;  %v5272_v62 = vld [vmem:[#allocation2 + $0x5a4] ss:$16 sps:$4 sm:$0xff]   ;;  %v5275_v63 = vld [vmem:[#allocation2 + $0x5ac] ss:$16 sps:$4 sm:$0xff]  }
  0xb1   :  { %2081 = vmatpush1.bf16.msra.mxu0 %v5180_v0  ;;  %2286 = vmatpush1.bf16.msra.mxu1 %v5183_v1  ;;  %v5270_v0 = vld [vmem:[#allocation2 + $0x5a0] ss:$16 sps:$4 sm:$0xff]   ;;  %v5273_v1 = vld [vmem:[#allocation2 + $0x5a8] ss:$16 sps:$4 sm:$0xff]  }
  0xb2   :  { %2082 = vmatprep.subr.bf16.mxu0 %v5188_v2  ;;  %2287 = vmatprep.subr.bf16.mxu1 %v5191_v3  ;;  %v5278_v2 = vld [vmem:[#allocation2 + $0x5c4] ss:$16 sps:$4 sm:$0xff]   ;;  %v5281_v3 = vld [vmem:[#allocation2 + $0x5cc] ss:$16 sps:$4 sm:$0xff]  }
  0xb5   :  { %2083 = vmatpush1.bf16.msra.mxu0 %v5186_v4  ;;  %2288 = vmatpush1.bf16.msra.mxu1 %v5189_v5  ;;  %v5276_v4 = vld [vmem:[#allocation2 + $0x5c0] ss:$16 sps:$4 sm:$0xff]   ;;  %v5279_v5 = vld [vmem:[#allocation2 + $0x5c8] ss:$16 sps:$4 sm:$0xff]  }
  0xb6   :  { %2093 = vmatprep.subr.bf16.mxu0 %v5194_v6  ;;  %2298 = vmatprep.subr.bf16.mxu1 %v5197_v8  ;;  %v5284_v6 = vld [vmem:[#allocation2 + $0x5e4] ss:$16 sps:$4 sm:$0xff]   ;;  %v5282_v8 = vld [vmem:[#allocation2 + $0x5e0] ss:$16 sps:$4 sm:$0xff]  }
  0xb8   :  { %2085 = vmatmul.mubr.bf16.vlgmr.msra.gmra.mrb[0].mxu0 %v403_v11  ;;  %2290 = vmatmul.mubr.bf16.vlgmr.msra.gmra.mrb[0].mxu1 %v403_v11  ;;  %v75_v11 = vld [vmem:[%s6269_s0 + $0x20] sm:$0xff] }
  0xb9   :  { %2094 = vmatpush1.bf16.msra.mxu0 %v5192_v9  ;;  %2299 = vmatpush1.bf16.msra.mxu1 %v5195_v10  ;;  %v5285_v9 = vld [vmem:[#allocation2 + $0x5e8] ss:$16 sps:$4 sm:$0xff]   ;;  %v5290_v10 = vld [vmem:[#allocation2 + $0x604] ss:$16 sps:$4 sm:$0xff]  }
  0xba   :  { %2095 = vmatprep.subr.bf16.mxu0 %v5200_v12  ;;  %2300 = vmatprep.subr.bf16.mxu1 %v5203_v13  ;;  %v5293_v12 = vld [vmem:[#allocation2 + $0x60c] ss:$16 sps:$4 sm:$0xff]   ;;  %v5288_v13 = vld [vmem:[#allocation2 + $0x600] ss:$16 sps:$4 sm:$0xff]  }
  0xbb   :  { %2125 = vmatprep.mubr.bf16.mxu0 %v406_v15  ;;  %2330 = vmatprep.mubr.bf16.mxu1 %v406_v15  ;;  %v405_v15 = vpack.c.bf16 %v75_v11, %v75_v11  ;;  %v5383_v11 = vld [vmem:[#allocation2 + $0x7ec] ss:$16 sps:$4 sm:$0xff]  }
  0xbd   :  { %2096 = vmatpush1.bf16.msra.mxu0 %v5198_v16  ;;  %2301 = vmatpush1.bf16.msra.mxu1 %v5201_v17  ;;  %v78_v16 = vld [vmem:[%s6269_s0 + $0x38] sm:$0xff]  ;;  %v5296_v17 = vld [vmem:[#allocation2 + $0x624] ss:$16 sps:$4 sm:$0xff]  }
  0xbe   :  { %2097 = vmatprep.subr.bf16.mxu0 %v5206_v18  ;;  %2302 = vmatprep.subr.bf16.mxu1 %v5209_v19  ;;  %v5299_v18 = vld [vmem:[#allocation2 + $0x62c] ss:$16 sps:$4 sm:$0xff]   ;;  %v408_v19 = vpack.c.bf16 %v78_v16, %v78_v16 }
  0xbf   :  { %v5389_v16 = vld [vmem:[#allocation2 + $0x80c] ss:$16 sps:$4 sm:$0xff]  }
  0xc1   :  { %2098 = vmatpush1.bf16.msra.mxu0 %v5204_v20  ;;  %2303 = vmatpush1.bf16.msra.mxu1 %v5207_v21  ;;  %v5294_v20 = vld [vmem:[#allocation2 + $0x620] ss:$16 sps:$4 sm:$0xff]   ;;  %v5297_v21 = vld [vmem:[#allocation2 + $0x628] ss:$16 sps:$4 sm:$0xff]  }
  0xc2   :  { %2099 = vmatprep.subr.bf16.mxu0 %v5212_v22  ;;  %2304 = vmatprep.subr.bf16.mxu1 %v5215_v23  ;;  %v5302_v22 = vld [vmem:[#allocation2 + $0x644] ss:$16 sps:$4 sm:$0xff]   ;;  %v5305_v23 = vld [vmem:[#allocation2 + $0x64c] ss:$16 sps:$4 sm:$0xff]  }
  0xc5   :  { %2100 = vmatpush1.bf16.msra.mxu0 %v5210_v24  ;;  %2305 = vmatpush1.bf16.msra.mxu1 %v5213_v25  ;;  %v5300_v24 = vld [vmem:[#allocation2 + $0x640] ss:$16 sps:$4 sm:$0xff]   ;;  %v5303_v25 = vld [vmem:[#allocation2 + $0x648] ss:$16 sps:$4 sm:$0xff]  }
  0xc6   :  { %2101 = vmatprep.subr.bf16.mxu0 %v5218_v26  ;;  %2306 = vmatprep.subr.bf16.mxu1 %v5221_v27  ;;  %v5308_v26 = vld [vmem:[#allocation2 + $0x664] ss:$16 sps:$4 sm:$0xff]   ;;  %v5311_v27 = vld [vmem:[#allocation2 + $0x66c] ss:$16 sps:$4 sm:$0xff]  }
  0xc9   :  { %2102 = vmatpush1.bf16.msra.mxu0 %v5216_v28  ;;  %2307 = vmatpush1.bf16.msra.mxu1 %v5219_v29  ;;  %v5306_v28 = vld [vmem:[#allocation2 + $0x660] ss:$16 sps:$4 sm:$0xff]   ;;  %v5309_v29 = vld [vmem:[#allocation2 + $0x668] ss:$16 sps:$4 sm:$0xff]  }
  0xca   :  { %2103 = vmatprep.subr.bf16.mxu0 %v5224_v30  ;;  %2308 = vmatprep.subr.bf16.mxu1 %v5227_v31  ;;  %v5314_v30 = vld [vmem:[#allocation2 + $0x684] ss:$16 sps:$4 sm:$0xff]   ;;  %v5317_v31 = vld [vmem:[#allocation2 + $0x68c] ss:$16 sps:$4 sm:$0xff]  }
  0xcd   :  { %2104 = vmatpush1.bf16.msra.mxu0 %v5222_v32  ;;  %2309 = vmatpush1.bf16.msra.mxu1 %v5225_v33  ;;  %v5312_v32 = vld [vmem:[#allocation2 + $0x680] ss:$16 sps:$4 sm:$0xff]   ;;  %v5315_v33 = vld [vmem:[#allocation2 + $0x688] ss:$16 sps:$4 sm:$0xff]  }
  0xce   :  { %2105 = vmatprep.subr.bf16.mxu0 %v5230_v34  ;;  %2310 = vmatprep.subr.bf16.mxu1 %v5233_v35  ;;  %v5320_v34 = vld [vmem:[#allocation2 + $0x6a4] ss:$16 sps:$4 sm:$0xff]   ;;  %v5323_v35 = vld [vmem:[#allocation2 + $0x6ac] ss:$16 sps:$4 sm:$0xff]  }
  0xd1   :  { %2106 = vmatpush1.bf16.msra.mxu0 %v5228_v36  ;;  %2311 = vmatpush1.bf16.msra.mxu1 %v5231_v37  ;;  %v5318_v36 = vld [vmem:[#allocation2 + $0x6a0] ss:$16 sps:$4 sm:$0xff]   ;;  %v5321_v37 = vld [vmem:[#allocation2 + $0x6a8] ss:$16 sps:$4 sm:$0xff]  }
  0xd2   :  { %2107 = vmatprep.subr.bf16.mxu0 %v5236_v38  ;;  %2312 = vmatprep.subr.bf16.mxu1 %v5239_v39  ;;  %v5326_v38 = vld [vmem:[#allocation2 + $0x6c4] ss:$16 sps:$4 sm:$0xff]   ;;  %v5329_v39 = vld [vmem:[#allocation2 + $0x6cc] ss:$16 sps:$4 sm:$0xff]  }
  0xd5   :  { %2108 = vmatpush1.bf16.msra.mxu0 %v5234_v40  ;;  %2313 = vmatpush1.bf16.msra.mxu1 %v5237_v41  ;;  %v5324_v40 = vld [vmem:[#allocation2 + $0x6c0] ss:$16 sps:$4 sm:$0xff]   ;;  %v5327_v41 = vld [vmem:[#allocation2 + $0x6c8] ss:$16 sps:$4 sm:$0xff]  }
  0xd6   :  { %2109 = vmatprep.subr.bf16.mxu0 %v5242_v42  ;;  %2314 = vmatprep.subr.bf16.mxu1 %v5245_v43  ;;  %v5332_v42 = vld [vmem:[#allocation2 + $0x6e4] ss:$16 sps:$4 sm:$0xff]   ;;  %v5335_v43 = vld [vmem:[#allocation2 + $0x6ec] ss:$16 sps:$4 sm:$0xff]  }
  0xd9   :  { %2110 = vmatpush1.bf16.msra.mxu0 %v5240_v44  ;;  %2315 = vmatpush1.bf16.msra.mxu1 %v5243_v45  ;;  %v5330_v44 = vld [vmem:[#allocation2 + $0x6e0] ss:$16 sps:$4 sm:$0xff]   ;;  %v5333_v45 = vld [vmem:[#allocation2 + $0x6e8] ss:$16 sps:$4 sm:$0xff]  }
  0xda   :  { %2111 = vmatprep.subr.bf16.mxu0 %v5248_v46  ;;  %2316 = vmatprep.subr.bf16.mxu1 %v5251_v47  ;;  %v5338_v46 = vld [vmem:[#allocation2 + $0x704] ss:$16 sps:$4 sm:$0xff]   ;;  %v5341_v47 = vld [vmem:[#allocation2 + $0x70c] ss:$16 sps:$4 sm:$0xff]  }
  0xdd   :  { %2112 = vmatpush1.bf16.msra.mxu0 %v5246_v48  ;;  %2317 = vmatpush1.bf16.msra.mxu1 %v5249_v49  ;;  %v5336_v48 = vld [vmem:[#allocation2 + $0x700] ss:$16 sps:$4 sm:$0xff]   ;;  %v5339_v49 = vld [vmem:[#allocation2 + $0x708] ss:$16 sps:$4 sm:$0xff]  }
  0xde   :  { %2113 = vmatprep.subr.bf16.mxu0 %v5254_v50  ;;  %2318 = vmatprep.subr.bf16.mxu1 %v5257_v51  ;;  %v5344_v50 = vld [vmem:[#allocation2 + $0x724] ss:$16 sps:$4 sm:$0xff]   ;;  %v5347_v51 = vld [vmem:[#allocation2 + $0x72c] ss:$16 sps:$4 sm:$0xff]  }
  0xe1   :  { %2114 = vmatpush1.bf16.msra.mxu0 %v5252_v52  ;;  %2319 = vmatpush1.bf16.msra.mxu1 %v5255_v53  ;;  %v5342_v52 = vld [vmem:[#allocation2 + $0x720] ss:$16 sps:$4 sm:$0xff]   ;;  %v5345_v53 = vld [vmem:[#allocation2 + $0x728] ss:$16 sps:$4 sm:$0xff]  }
  0xe2   :  { %2115 = vmatprep.subr.bf16.mxu0 %v5260_v54  ;;  %2320 = vmatprep.subr.bf16.mxu1 %v5263_v55  ;;  %v5350_v54 = vld [vmem:[#allocation2 + $0x744] ss:$16 sps:$4 sm:$0xff]   ;;  %v5353_v55 = vld [vmem:[#allocation2 + $0x74c] ss:$16 sps:$4 sm:$0xff]  }
  0xe5   :  { %2116 = vmatpush1.bf16.msra.mxu0 %v5258_v56  ;;  %2321 = vmatpush1.bf16.msra.mxu1 %v5261_v57  ;;  %v5348_v56 = vld [vmem:[#allocation2 + $0x740] ss:$16 sps:$4 sm:$0xff]   ;;  %v5351_v57 = vld [vmem:[#allocation2 + $0x748] ss:$16 sps:$4 sm:$0xff]  }
  0xe6   :  { %2117 = vmatprep.subr.bf16.mxu0 %v5266_v58  ;;  %2322 = vmatprep.subr.bf16.mxu1 %v5269_v59  ;;  %v5356_v58 = vld [vmem:[#allocation2 + $0x764] ss:$16 sps:$4 sm:$0xff]   ;;  %v5359_v59 = vld [vmem:[#allocation2 + $0x76c] ss:$16 sps:$4 sm:$0xff]  }
  0xe9   :  { %2118 = vmatpush1.bf16.msra.mxu0 %v5264_v60  ;;  %2323 = vmatpush1.bf16.msra.mxu1 %v5267_v61  ;;  %v5354_v60 = vld [vmem:[#allocation2 + $0x760] ss:$16 sps:$4 sm:$0xff]   ;;  %v5357_v61 = vld [vmem:[#allocation2 + $0x768] ss:$16 sps:$4 sm:$0xff]  }
  0xea   :  { %2119 = vmatprep.subr.bf16.mxu0 %v5272_v62  ;;  %2324 = vmatprep.subr.bf16.mxu1 %v5275_v63  ;;  %v5362_v62 = vld [vmem:[#allocation2 + $0x784] ss:$16 sps:$4 sm:$0xff]   ;;  %v5365_v63 = vld [vmem:[#allocation2 + $0x78c] ss:$16 sps:$4 sm:$0xff]  }
  0xed   :  { %2120 = vmatpush1.bf16.msra.mxu0 %v5270_v0  ;;  %2325 = vmatpush1.bf16.msra.mxu1 %v5273_v1  ;;  %v5360_v0 = vld [vmem:[#allocation2 + $0x780] ss:$16 sps:$4 sm:$0xff]   ;;  %v5363_v1 = vld [vmem:[#allocation2 + $0x788] ss:$16 sps:$4 sm:$0xff]  }
  0xee   :  { %2121 = vmatprep.subr.bf16.mxu0 %v5278_v2  ;;  %2326 = vmatprep.subr.bf16.mxu1 %v5281_v3  ;;  %v5368_v2 = vld [vmem:[#allocation2 + $0x7a4] ss:$16 sps:$4 sm:$0xff]   ;;  %v5371_v3 = vld [vmem:[#allocation2 + $0x7ac] ss:$16 sps:$4 sm:$0xff]  }
  0xf1   :  { %2122 = vmatpush1.bf16.msra.mxu0 %v5276_v4  ;;  %2327 = vmatpush1.bf16.msra.mxu1 %v5279_v5  ;;  %v5366_v4 = vld [vmem:[#allocation2 + $0x7a0] ss:$16 sps:$4 sm:$0xff]   ;;  %v5369_v5 = vld [vmem:[#allocation2 + $0x7a8] ss:$16 sps:$4 sm:$0xff]  }
  0xf2   :  { %2123 = vmatprep.subr.bf16.mxu0 %v5284_v6  ;;  %2328 = vmatprep.subr.bf16.mxu1 %v5287_v7  ;;  %v5374_v6 = vld [vmem:[#allocation2 + $0x7c4] ss:$16 sps:$4 sm:$0xff]   ;;  %v5377_v7 = vld [vmem:[#allocation2 + $0x7cc] ss:$16 sps:$4 sm:$0xff]  }
  0xf5   :  { %2124 = vmatpush1.bf16.msra.mxu0 %v5282_v8  ;;  %2329 = vmatpush1.bf16.msra.mxu1 %v5285_v9  ;;  %v5372_v8 = vld [vmem:[#allocation2 + $0x7c0] ss:$16 sps:$4 sm:$0xff]   ;;  %v5375_v9 = vld [vmem:[#allocation2 + $0x7c8] ss:$16 sps:$4 sm:$0xff]  }
  0xf6   :  { %2134 = vmatprep.subr.bf16.mxu0 %v5290_v10  ;;  %2339 = vmatprep.subr.bf16.mxu1 %v5293_v12  ;;  %v5380_v10 = vld [vmem:[#allocation2 + $0x7e4] ss:$16 sps:$4 sm:$0xff]   ;;  %v5378_v12 = vld [vmem:[#allocation2 + $0x7e0] ss:$16 sps:$4 sm:$0xff]  }
  0xf8   :  { %2126 = vmatmul.mubr.bf16.vlgmr.msra.gmra.mrb[0].mxu0 %v405_v15  ;;  %2331 = vmatmul.mubr.bf16.vlgmr.msra.gmra.mrb[0].mxu1 %v405_v15  ;;  %v5386_v15 = vld [vmem:[#allocation2 + $0x804] ss:$16 sps:$4 sm:$0xff]  }
  0xf9   :  { %2135 = vmatpush1.bf16.msra.mxu0 %v5288_v13  ;;  %2340 = vmatpush1.bf16.msra.mxu1 %v5291_v14  ;;  %v5381_v13 = vld [vmem:[#allocation2 + $0x7e8] ss:$16 sps:$4 sm:$0xff]   ;;  %v77_v14 = vld [vmem:[%s6269_s0 + $0x30] sm:$0xff] }
  0xfa   :  { %2136 = vmatprep.subr.bf16.mxu0 %v5296_v17  ;;  %2341 = vmatprep.subr.bf16.mxu1 %v5299_v18  ;;  %v80_v17 = vld [vmem:[%s6269_s0 + $0x48] sm:$0xff]  ;;  %v5384_v18 = vld [vmem:[#allocation2 + $0x800] ss:$16 sps:$4 sm:$0xff]  }
  0xfb   :  { %2166 = vmatprep.mubr.bf16.mxu0 %v408_v19  ;;  %2371 = vmatprep.mubr.bf16.mxu1 %v408_v19  ;;  %v407_v19 = vpack.c.bf16 %v77_v14, %v77_v14  ;;  %v5476_v14 = vld [vmem:[#allocation2 + $0x9e4] ss:$16 sps:$4 sm:$0xff]  }
  0xfd   :  { %2137 = vmatpush1.bf16.msra.mxu0 %v5294_v20  ;;  %2342 = vmatpush1.bf16.msra.mxu1 %v5297_v21  ;;  %v5387_v20 = vld [vmem:[#allocation2 + $0x808] ss:$16 sps:$4 sm:$0xff]   ;;  %v5392_v21 = vld [vmem:[#allocation2 + $0x824] ss:$16 sps:$4 sm:$0xff]  }
  0xfe   :  { %2138 = vmatprep.subr.bf16.mxu0 %v5302_v22  ;;  %2343 = vmatprep.subr.bf16.mxu1 %v5305_v23  ;;  %v5395_v22 = vld [vmem:[#allocation2 + $0x82c] ss:$16 sps:$4 sm:$0xff]   ;;  %v410_v23 = vpack.c.bf16 %v80_v17, %v80_v17  ;;  %v2503_v17 = vld [vmem:[%s6271_s2 + $0x90] sm:$0xff] }
 0x101   :  { %2139 = vmatpush1.bf16.msra.mxu0 %v5300_v24  ;;  %2344 = vmatpush1.bf16.msra.mxu1 %v5303_v25  ;;  %v5390_v24 = vld [vmem:[#allocation2 + $0x820] ss:$16 sps:$4 sm:$0xff]   ;;  %v5393_v25 = vld [vmem:[#allocation2 + $0x828] ss:$16 sps:$4 sm:$0xff]  }
 0x102   :  { %2140 = vmatprep.subr.bf16.mxu0 %v5308_v26  ;;  %2345 = vmatprep.subr.bf16.mxu1 %v5311_v27  ;;  %v5398_v26 = vld [vmem:[#allocation2 + $0x844] ss:$16 sps:$4 sm:$0xff]   ;;  %v5401_v27 = vld [vmem:[#allocation2 + $0x84c] ss:$16 sps:$4 sm:$0xff]  }
 0x105   :  { %2141 = vmatpush1.bf16.msra.mxu0 %v5306_v28  ;;  %2346 = vmatpush1.bf16.msra.mxu1 %v5309_v29  ;;  %v5396_v28 = vld [vmem:[#allocation2 + $0x840] ss:$16 sps:$4 sm:$0xff]   ;;  %v5399_v29 = vld [vmem:[#allocation2 + $0x848] ss:$16 sps:$4 sm:$0xff]  }
 0x106   :  { %2142 = vmatprep.subr.bf16.mxu0 %v5314_v30  ;;  %2347 = vmatprep.subr.bf16.mxu1 %v5317_v31  ;;  %v5404_v30 = vld [vmem:[#allocation2 + $0x864] ss:$16 sps:$4 sm:$0xff]   ;;  %v5407_v31 = vld [vmem:[#allocation2 + $0x86c] ss:$16 sps:$4 sm:$0xff]  }
 0x109   :  { %2143 = vmatpush1.bf16.msra.mxu0 %v5312_v32  ;;  %2348 = vmatpush1.bf16.msra.mxu1 %v5315_v33  ;;  %v5402_v32 = vld [vmem:[#allocation2 + $0x860] ss:$16 sps:$4 sm:$0xff]   ;;  %v5405_v33 = vld [vmem:[#allocation2 + $0x868] ss:$16 sps:$4 sm:$0xff]  }
 0x10a   :  { %2144 = vmatprep.subr.bf16.mxu0 %v5320_v34  ;;  %2349 = vmatprep.subr.bf16.mxu1 %v5323_v35  ;;  %v5410_v34 = vld [vmem:[#allocation2 + $0x884] ss:$16 sps:$4 sm:$0xff]   ;;  %v5413_v35 = vld [vmem:[#allocation2 + $0x88c] ss:$16 sps:$4 sm:$0xff]  }
 0x10d   :  { %2145 = vmatpush1.bf16.msra.mxu0 %v5318_v36  ;;  %2350 = vmatpush1.bf16.msra.mxu1 %v5321_v37  ;;  %v5408_v36 = vld [vmem:[#allocation2 + $0x880] ss:$16 sps:$4 sm:$0xff]   ;;  %v5411_v37 = vld [vmem:[#allocation2 + $0x888] ss:$16 sps:$4 sm:$0xff]  }
 0x10e   :  { %2146 = vmatprep.subr.bf16.mxu0 %v5326_v38  ;;  %2351 = vmatprep.subr.bf16.mxu1 %v5329_v39  ;;  %v5416_v38 = vld [vmem:[#allocation2 + $0x8a4] ss:$16 sps:$4 sm:$0xff]   ;;  %v5419_v39 = vld [vmem:[#allocation2 + $0x8ac] ss:$16 sps:$4 sm:$0xff]  }
 0x111   :  { %2147 = vmatpush1.bf16.msra.mxu0 %v5324_v40  ;;  %2352 = vmatpush1.bf16.msra.mxu1 %v5327_v41  ;;  %v5414_v40 = vld [vmem:[#allocation2 + $0x8a0] ss:$16 sps:$4 sm:$0xff]   ;;  %v5417_v41 = vld [vmem:[#allocation2 + $0x8a8] ss:$16 sps:$4 sm:$0xff]  }
 0x112   :  { %2148 = vmatprep.subr.bf16.mxu0 %v5332_v42  ;;  %2353 = vmatprep.subr.bf16.mxu1 %v5335_v43  ;;  %v5422_v42 = vld [vmem:[#allocation2 + $0x8c4] ss:$16 sps:$4 sm:$0xff]   ;;  %v5425_v43 = vld [vmem:[#allocation2 + $0x8cc] ss:$16 sps:$4 sm:$0xff]  }
 0x115   :  { %2149 = vmatpush1.bf16.msra.mxu0 %v5330_v44  ;;  %2354 = vmatpush1.bf16.msra.mxu1 %v5333_v45  ;;  %v5420_v44 = vld [vmem:[#allocation2 + $0x8c0] ss:$16 sps:$4 sm:$0xff]   ;;  %v5423_v45 = vld [vmem:[#allocation2 + $0x8c8] ss:$16 sps:$4 sm:$0xff]  }
 0x116   :  { %2150 = vmatprep.subr.bf16.mxu0 %v5338_v46  ;;  %2355 = vmatprep.subr.bf16.mxu1 %v5341_v47  ;;  %v5428_v46 = vld [vmem:[#allocation2 + $0x8e4] ss:$16 sps:$4 sm:$0xff]   ;;  %v5431_v47 = vld [vmem:[#allocation2 + $0x8ec] ss:$16 sps:$4 sm:$0xff]  }
 0x119   :  { %2151 = vmatpush1.bf16.msra.mxu0 %v5336_v48  ;;  %2356 = vmatpush1.bf16.msra.mxu1 %v5339_v49  ;;  %v5426_v48 = vld [vmem:[#allocation2 + $0x8e0] ss:$16 sps:$4 sm:$0xff]   ;;  %v5429_v49 = vld [vmem:[#allocation2 + $0x8e8] ss:$16 sps:$4 sm:$0xff]  }
 0x11a   :  { %2152 = vmatprep.subr.bf16.mxu0 %v5344_v50  ;;  %2357 = vmatprep.subr.bf16.mxu1 %v5347_v51  ;;  %v5434_v50 = vld [vmem:[#allocation2 + $0x904] ss:$16 sps:$4 sm:$0xff]   ;;  %v5437_v51 = vld [vmem:[#allocation2 + $0x90c] ss:$16 sps:$4 sm:$0xff]  }
 0x11d   :  { %2153 = vmatpush1.bf16.msra.mxu0 %v5342_v52  ;;  %2358 = vmatpush1.bf16.msra.mxu1 %v5345_v53  ;;  %v5432_v52 = vld [vmem:[#allocation2 + $0x900] ss:$16 sps:$4 sm:$0xff]   ;;  %v5435_v53 = vld [vmem:[#allocation2 + $0x908] ss:$16 sps:$4 sm:$0xff]  }
 0x11e   :  { %2154 = vmatprep.subr.bf16.mxu0 %v5350_v54  ;;  %2359 = vmatprep.subr.bf16.mxu1 %v5353_v55  ;;  %v5440_v54 = vld [vmem:[#allocation2 + $0x924] ss:$16 sps:$4 sm:$0xff]   ;;  %v5443_v55 = vld [vmem:[#allocation2 + $0x92c] ss:$16 sps:$4 sm:$0xff]  }
 0x121   :  { %2155 = vmatpush1.bf16.msra.mxu0 %v5348_v56  ;;  %2360 = vmatpush1.bf16.msra.mxu1 %v5351_v57  ;;  %v5438_v56 = vld [vmem:[#allocation2 + $0x920] ss:$16 sps:$4 sm:$0xff]   ;;  %v5441_v57 = vld [vmem:[#allocation2 + $0x928] ss:$16 sps:$4 sm:$0xff]  }
 0x122   :  { %2156 = vmatprep.subr.bf16.mxu0 %v5356_v58  ;;  %2361 = vmatprep.subr.bf16.mxu1 %v5359_v59  ;;  %v5446_v58 = vld [vmem:[#allocation2 + $0x944] ss:$16 sps:$4 sm:$0xff]   ;;  %v5449_v59 = vld [vmem:[#allocation2 + $0x94c] ss:$16 sps:$4 sm:$0xff]  }
 0x125   :  { %2157 = vmatpush1.bf16.msra.mxu0 %v5354_v60  ;;  %2362 = vmatpush1.bf16.msra.mxu1 %v5357_v61  ;;  %v5444_v60 = vld [vmem:[#allocation2 + $0x940] ss:$16 sps:$4 sm:$0xff]   ;;  %v5447_v61 = vld [vmem:[#allocation2 + $0x948] ss:$16 sps:$4 sm:$0xff]  }
 0x126   :  { %2158 = vmatprep.subr.bf16.mxu0 %v5362_v62  ;;  %2363 = vmatprep.subr.bf16.mxu1 %v5365_v63  ;;  %v5452_v62 = vld [vmem:[#allocation2 + $0x964] ss:$16 sps:$4 sm:$0xff]   ;;  %v5455_v63 = vld [vmem:[#allocation2 + $0x96c] ss:$16 sps:$4 sm:$0xff]  }
 0x129   :  { %2159 = vmatpush1.bf16.msra.mxu0 %v5360_v0  ;;  %2364 = vmatpush1.bf16.msra.mxu1 %v5363_v1  ;;  %v5450_v0 = vld [vmem:[#allocation2 + $0x960] ss:$16 sps:$4 sm:$0xff]   ;;  %v5453_v1 = vld [vmem:[#allocation2 + $0x968] ss:$16 sps:$4 sm:$0xff]  }
 0x12a   :  { %2160 = vmatprep.subr.bf16.mxu0 %v5368_v2  ;;  %2365 = vmatprep.subr.bf16.mxu1 %v5371_v3  ;;  %v5458_v2 = vld [vmem:[#allocation2 + $0x984] ss:$16 sps:$4 sm:$0xff]   ;;  %v5461_v3 = vld [vmem:[#allocation2 + $0x98c] ss:$16 sps:$4 sm:$0xff]  }
 0x12d   :  { %2161 = vmatpush1.bf16.msra.mxu0 %v5366_v4  ;;  %2366 = vmatpush1.bf16.msra.mxu1 %v5369_v5  ;;  %v5456_v4 = vld [vmem:[#allocation2 + $0x980] ss:$16 sps:$4 sm:$0xff]   ;;  %v5459_v5 = vld [vmem:[#allocation2 + $0x988] ss:$16 sps:$4 sm:$0xff]  }
 0x12e   :  { %2162 = vmatprep.subr.bf16.mxu0 %v5374_v6  ;;  %2367 = vmatprep.subr.bf16.mxu1 %v5377_v7  ;;  %v5464_v6 = vld [vmem:[#allocation2 + $0x9a4] ss:$16 sps:$4 sm:$0xff]   ;;  %v5467_v7 = vld [vmem:[#allocation2 + $0x9ac] ss:$16 sps:$4 sm:$0xff]  }
 0x131   :  { %2163 = vmatpush1.bf16.msra.mxu0 %v5372_v8  ;;  %2368 = vmatpush1.bf16.msra.mxu1 %v5375_v9  ;;  %v5462_v8 = vld [vmem:[#allocation2 + $0x9a0] ss:$16 sps:$4 sm:$0xff]   ;;  %v5465_v9 = vld [vmem:[#allocation2 + $0x9a8] ss:$16 sps:$4 sm:$0xff]  }
 0x132   :  { %2164 = vmatprep.subr.bf16.mxu0 %v5380_v10  ;;  %2369 = vmatprep.subr.bf16.mxu1 %v5383_v11  ;;  %v5470_v10 = vld [vmem:[#allocation2 + $0x9c4] ss:$16 sps:$4 sm:$0xff]   ;;  %v5473_v11 = vld [vmem:[#allocation2 + $0x9cc] ss:$16 sps:$4 sm:$0xff]  }
 0x135   :  { %2165 = vmatpush1.bf16.msra.mxu0 %v5378_v12  ;;  %2370 = vmatpush1.bf16.msra.mxu1 %v5381_v13  ;;  %v5468_v12 = vld [vmem:[#allocation2 + $0x9c0] ss:$16 sps:$4 sm:$0xff]   ;;  %v5471_v13 = vld [vmem:[#allocation2 + $0x9c8] ss:$16 sps:$4 sm:$0xff]  }
 0x136   :  { %2175 = vmatprep.subr.bf16.mxu0 %v5386_v15  ;;  %2380 = vmatprep.subr.bf16.mxu1 %v5389_v16  ;;  %v5479_v15 = vld [vmem:[#allocation2 + $0x9ec] ss:$16 sps:$4 sm:$0xff]  }
 0x137   :  { %v2502_v16 = vld [vmem:[%s6271_s2 + $0x88] sm:$0xff] }
 0x138   :  { %2167 = vmatmul.mubr.bf16.vlgmr.msra.gmra.mrb[0].mxu0 %v407_v19  ;;  %2372 = vmatmul.mubr.bf16.vlgmr.msra.gmra.mrb[0].mxu1 %v407_v19  ;;  %v2535_v19 = vld [vmem:[%s6271_s2 + $0x190] sm:$0xff] }
 0x139   :  { %2176 = vmatpush1.bf16.msra.mxu0 %v5384_v18  ;;  %2381 = vmatpush1.bf16.msra.mxu1 %v5387_v20  ;;  %v2534_v18 = vld [vmem:[%s6271_s2 + $0x188] sm:$0xff]  ;;  %v5474_v20 = vld [vmem:[#allocation2 + $0x9e0] ss:$16 sps:$4 sm:$0xff]  }
 0x13a   :  { %2177 = vmatprep.subr.bf16.mxu0 %v5392_v21  ;;  %2382 = vmatprep.subr.bf16.mxu1 %v5395_v22  ;;  %v5477_v21 = vld [vmem:[#allocation2 + $0x9e8] ss:$16 sps:$4 sm:$0xff]   ;;  %v79_v22 = vld [vmem:[%s6269_s0 + $0x40] sm:$0xff] }
 0x13b   :  { %2207 = vmatprep.mubr.bf16.mxu0 %v410_v23  ;;  %2412 = vmatprep.mubr.bf16.mxu1 %v410_v23  ;;  %v2486_v23 = vld [vmem:[%s6271_s2 + $0x8] sm:$0xff] }
 0x13d   :  { %2178 = vmatpush1.bf16.msra.mxu0 %v5390_v24  ;;  %2383 = vmatpush1.bf16.msra.mxu1 %v5393_v25  ;;  %v2487_v24 = vld [vmem:[%s6271_s2 + $0x10] sm:$0xff]  ;;  %v4798_v25 = vpack.c.bf16 %v2503_v17, %v2502_v16  ;;  %v2512_v16 = vld [vmem:[%s6271_s2 + $0xd8] sm:$0xff]  ;;  %v2513_v17 = vld [vmem:[%s6271_s2 + $0xe0] sm:$0xff] }
 0x13e   :  { %2179 = vmatprep.subr.bf16.mxu0 %v5398_v26  ;;  %2384 = vmatprep.subr.bf16.mxu1 %v5401_v27  ;;  %v4830_v26 = vpack.c.bf16 %v2535_v19, %v2534_v18  ;;  %v2518_v27 = vld [vmem:[%s6271_s2 + $0x108] sm:$0xff]  ;;  %v2544_v18 = vld [vmem:[%s6271_s2 + $0x1d8] sm:$0xff]  ;;  %v4818_v19 = vpack.c.bf16 %v2513_v17, %v2512_v16 }
 0x141   :  { %2180 = vmatpush1.bf16.msra.mxu0 %v5396_v28  ;;  %2385 = vmatpush1.bf16.msra.mxu1 %v5399_v29  ;;  %v2519_v28 = vld [vmem:[%s6271_s2 + $0x110] sm:$0xff]  ;;  %v2504_v29 = vld [vmem:[%s6271_s2 + $0x98] sm:$0xff] }
 0x142   :  { %2181 = vmatprep.subr.bf16.mxu0 %v5404_v30  ;;  %2386 = vmatprep.subr.bf16.mxu1 %v5407_v31  ;;  %v2505_v30 = vld [vmem:[%s6271_s2 + $0xa0] sm:$0xff]  ;;  %v2536_v31 = vld [vmem:[%s6271_s2 + $0x198] sm:$0xff] }
 0x145   :  { %2182 = vmatpush1.bf16.msra.mxu0 %v5402_v32  ;;  %2387 = vmatpush1.bf16.msra.mxu1 %v5405_v33  ;;  %v2537_v32 = vld [vmem:[%s6271_s2 + $0x1a0] sm:$0xff]  ;;  %v409_v33 = vpack.c.bf16 %v79_v22, %v79_v22 }
 0x146   :  { %2183 = vmatprep.subr.bf16.mxu0 %v5410_v34  ;;  %2388 = vmatprep.subr.bf16.mxu1 %v5413_v35  ;;  %v4800_v34 = vpack.c.bf16 %v2487_v24, %v2486_v23  ;;  %v4832_v35 = vpack.c.bf16 %v2519_v28, %v2518_v27  ;;  %v2497_v22 = vld [vmem:[%s6271_s2 + $0x60] sm:$0xff]  ;;  %v2514_v28 = vld [vmem:[%s6271_s2 + $0xe8] sm:$0xff] }
 0x149   :  { %2184 = vmatpush1.bf16.msra.mxu0 %v5408_v36  ;;  %2389 = vmatpush1.bf16.msra.mxu1 %v5411_v37  ;;  %v2488_v36 = vld [vmem:[%s6271_s2 + $0x18] sm:$0xff]  ;;  %v2489_v37 = vld [vmem:[%s6271_s2 + $0x20] sm:$0xff] }
 0x14a   :  { %2185 = vmatprep.subr.bf16.mxu0 %v5416_v38  ;;  %2390 = vmatprep.subr.bf16.mxu1 %v5419_v39  ;;  %v4802_v38 = vpack.c.bf16 %v2505_v30, %v2504_v29  ;;  %v4834_v39 = vpack.c.bf16 %v2537_v32, %v2536_v31  ;;  %v2515_v29 = vld [vmem:[%s6271_s2 + $0xf0] sm:$0xff]  ;;  %v2546_v30 = vld [vmem:[%s6271_s2 + $0x1e8] sm:$0xff] }
 0x14b   :  { %v4822_v31 = vpack.c.bf16 %v2515_v29, %v2514_v28  ;;  %v2547_v32 = vld [vmem:[%s6271_s2 + $0x1f0] sm:$0xff] }
 0x14d   :  { %2186 = vmatpush1.bf16.msra.mxu0 %v5414_v40  ;;  %2391 = vmatpush1.bf16.msra.mxu1 %v5417_v41  ;;  %v2520_v40 = vld [vmem:[%s6271_s2 + $0x118] sm:$0xff]  ;;  %v2521_v41 = vld [vmem:[%s6271_s2 + $0x120] sm:$0xff] }
 0x14e   :  { %2187 = vmatprep.subr.bf16.mxu0 %v5422_v42  ;;  %2392 = vmatprep.subr.bf16.mxu1 %v5425_v43  ;;  %v2506_v42 = vld [vmem:[%s6271_s2 + $0xa8] sm:$0xff]  ;;  %v2507_v43 = vld [vmem:[%s6271_s2 + $0xb0] sm:$0xff] }
 0x151   :  { %2188 = vmatpush1.bf16.msra.mxu0 %v5420_v44  ;;  %2393 = vmatpush1.bf16.msra.mxu1 %v5423_v45  ;;  %v2538_v44 = vld [vmem:[%s6271_s2 + $0x1a8] sm:$0xff]  ;;  %v2539_v45 = vld [vmem:[%s6271_s2 + $0x1b0] sm:$0xff] }
 0x152   :  { %2189 = vmatprep.subr.bf16.mxu0 %v5428_v46  ;;  %2394 = vmatprep.subr.bf16.mxu1 %v5431_v47  ;;  %v4804_v46 = vpack.c.bf16 %v2489_v37, %v2488_v36  ;;  %v4836_v47 = vpack.c.bf16 %v2521_v41, %v2520_v40  ;;  %v2530_v37 = vld [vmem:[%s6271_s2 + $0x168] sm:$0xff]  ;;  %v2517_v41 = vld [vmem:[%s6271_s2 + $0x100] sm:$0xff] }
 0x155   :  { %2190 = vmatpush1.bf16.msra.mxu0 %v5426_v48  ;;  %2395 = vmatpush1.bf16.msra.mxu1 %v5429_v49  ;;  %v2490_v48 = vld [vmem:[%s6271_s2 + $0x28] sm:$0xff]  ;;  %v4806_v49 = vpack.c.bf16 %v2507_v43, %v2506_v42  ;;  %v2548_v42 = vld [vmem:[%s6271_s2 + $0x1f8] sm:$0xff]  ;;  %v2549_v43 = vld [vmem:[%s6271_s2 + $0x200] sm:$0xff] }
 0x156   :  { %2191 = vmatprep.subr.bf16.mxu0 %v5434_v50  ;;  %2396 = vmatprep.subr.bf16.mxu1 %v5437_v51  ;;  %v4838_v50 = vpack.c.bf16 %v2539_v45, %v2538_v44  ;;  %v2491_v51 = vld [vmem:[%s6271_s2 + $0x30] sm:$0xff]  ;;  %v4858_v45 = vpack.c.bf16 %v2549_v43, %v2548_v42 }
 0x159   :  { %2192 = vmatpush1.bf16.msra.mxu0 %v5432_v52  ;;  %2397 = vmatpush1.bf16.msra.mxu1 %v5435_v53  ;;  %v2522_v52 = vld [vmem:[%s6271_s2 + $0x128] sm:$0xff]  ;;  %v2523_v53 = vld [vmem:[%s6271_s2 + $0x130] sm:$0xff] }
 0x15a   :  { %2193 = vmatprep.subr.bf16.mxu0 %v5440_v54  ;;  %2398 = vmatprep.subr.bf16.mxu1 %v5443_v55  ;;  %v4808_v54 = vpack.c.bf16 %v2491_v51, %v2490_v48  ;;  %v4840_v55 = vpack.c.bf16 %v2523_v53, %v2522_v52  ;;  %v2532_v48 = vld [vmem:[%s6271_s2 + $0x178] sm:$0xff]  ;;  %v62_v52 = vlaneseq }
 0x15c   :  { %v5968_v53 = vshrl.u32 %v62_v52, 7 }
 0x15d   :  { %2194 = vmatpush1.bf16.msra.mxu0 %v5438_v56  ;;  %2399 = vmatpush1.bf16.msra.mxu1 %v5441_v57  ;;  %v2508_v56 = vld [vmem:[%s6271_s2 + $0xb8] sm:$0xff]  ;;  %v2509_v57 = vld [vmem:[%s6271_s2 + $0xc0] sm:$0xff] }
 0x15e   :  { %2195 = vmatprep.subr.bf16.mxu0 %v5446_v58  ;;  %2400 = vmatprep.subr.bf16.mxu1 %v5449_v59  ;;  %v2540_v58 = vld [vmem:[%s6271_s2 + $0x1b8] sm:$0xff]  ;;  %v4810_v59 = vpack.c.bf16 %v2509_v57, %v2508_v56  ;;  %vm64_vm0 = vcmp.eq.s32.totalorder %v5968_v53, 0  ;;  %v5677_v56 = vmov 0.0   ;;  %vm68_vm2 = vcmp.lt.s32.totalorder %v5968_v53, 2 }
 0x15f   :  { %v5976_v57 = vsel %vm64_vm0, 1.0, %v5677_v56 }
 0x160   :  { %v5999_v42 = vsub.f32 1.0, %v5976_v57 }
 0x161   :  { %2196 = vmatpush1.bf16.msra.mxu0 %v5444_v60  ;;  %2401 = vmatpush1.bf16.msra.mxu1 %v5447_v61  ;;  %v2541_v60 = vld [vmem:[%s6271_s2 + $0x1c0] sm:$0xff]  ;;  %v2492_v61 = vld [vmem:[%s6271_s2 + $0x38] sm:$0xff] }
 0x162   :  { %2197 = vmatprep.subr.bf16.mxu0 %v5452_v62  ;;  %2402 = vmatprep.subr.bf16.mxu1 %v5455_v63  ;;  %v2493_v62 = vld [vmem:[%s6271_s2 + $0x40] sm:$0xff]  ;;  %v4842_v63 = vpack.c.bf16 %v2541_v60, %v2540_v58 }
 0x165   :  { %2198 = vmatpush1.bf16.msra.mxu0 %v5450_v0  ;;  %2403 = vmatpush1.bf16.msra.mxu1 %v5453_v1  ;;  %v4812_v0 = vpack.c.bf16 %v2493_v62, %v2492_v61  ;;  %v2524_v1 = vld [vmem:[%s6271_s2 + $0x138] sm:$0xff] }
 0x166   :  { %2199 = vmatprep.subr.bf16.mxu0 %v5458_v2  ;;  %2404 = vmatprep.subr.bf16.mxu1 %v5461_v3  ;;  %v2525_v2 = vld [vmem:[%s6271_s2 + $0x140] sm:$0xff] }
 0x167   :  { %v4844_v3 = vpack.c.bf16 %v2525_v2, %v2524_v1 }
 0x169   :  { %2200 = vmatpush1.bf16.msra.mxu0 %v5456_v4  ;;  %2405 = vmatpush1.bf16.msra.mxu1 %v5459_v5  ;;  %v2510_v4 = vld [vmem:[%s6271_s2 + $0xc8] sm:$0xff]  ;;  %v2511_v5 = vld [vmem:[%s6271_s2 + $0xd0] sm:$0xff] }
 0x16a   :  { %2201 = vmatprep.subr.bf16.mxu0 %v5464_v6  ;;  %2406 = vmatprep.subr.bf16.mxu1 %v5467_v7  ;;  %v2542_v6 = vld [vmem:[%s6271_s2 + $0x1c8] sm:$0xff]  ;;  %v4814_v7 = vpack.c.bf16 %v2511_v5, %v2510_v4 }
 0x16d   :  { %2202 = vmatpush1.bf16.msra.mxu0 %v5462_v8  ;;  %2407 = vmatpush1.bf16.msra.mxu1 %v5465_v9  ;;  %v2543_v8 = vld [vmem:[%s6271_s2 + $0x1d0] sm:$0xff]  ;;  %v2494_v9 = vld [vmem:[%s6271_s2 + $0x48] sm:$0xff] }
 0x16e   :  { %2203 = vmatprep.subr.bf16.mxu0 %v5470_v10  ;;  %2408 = vmatprep.subr.bf16.mxu1 %v5473_v11  ;;  %v2495_v10 = vld [vmem:[%s6271_s2 + $0x50] sm:$0xff]  ;;  %v4846_v11 = vpack.c.bf16 %v2543_v8, %v2542_v6 }
 0x171   :  { %2204 = vmatpush1.bf16.msra.mxu0 %v5468_v12  ;;  %2409 = vmatpush1.bf16.msra.mxu1 %v5471_v13  ;;  %v4816_v12 = vpack.c.bf16 %v2495_v10, %v2494_v9  ;;  %v2526_v13 = vld [vmem:[%s6271_s2 + $0x148] sm:$0xff] }
 0x172   :  { %2205 = vmatprep.subr.bf16.mxu0 %v5476_v14  ;;  %2410 = vmatprep.subr.bf16.mxu1 %v5479_v15  ;;  %v2527_v14 = vld [vmem:[%s6271_s2 + $0x150] sm:$0xff] }
 0x173   :  { %v4848_v15 = vpack.c.bf16 %v2527_v14, %v2526_v13 }
 0x175   :  { %2206 = vmatpush1.bf16.msra.mxu0 %v5474_v20  ;;  %2411 = vmatpush1.bf16.msra.mxu1 %v5477_v21  ;;  %v2545_v20 = vld [vmem:[%s6271_s2 + $0x1e0] sm:$0xff]  ;;  %v2496_v21 = vld [vmem:[%s6271_s2 + $0x58] sm:$0xff] }
 0x176   :  { %4799 = vmatprep.subr.bf16.mxu0 %v4798_v25  ;;  %4831 = vmatprep.subr.bf16.mxu1 %v4830_v26  ;;  %v4850_v23 = vpack.c.bf16 %v2545_v20, %v2544_v18  ;;  %v4820_v24 = vpack.c.bf16 %v2497_v22, %v2496_v21  ;;  %v2528_v25 = vld [vmem:[%s6271_s2 + $0x158] sm:$0xff]  ;;  %v2529_v26 = vld [vmem:[%s6271_s2 + $0x160] sm:$0xff] }
 0x177   :  { %v4852_v27 = vpack.c.bf16 %v2529_v26, %v2528_v25 }
 0x178   :  { %2208 = vmatmul.mubr.bf16.vlgmr.msra.gmra.mrb[0].mxu0 %v409_v33  ;;  %2413 = vmatmul.mubr.bf16.vlgmr.msra.gmra.mrb[0].mxu1 %v409_v33  ;;  %v2498_v33 = vld [vmem:[%s6271_s2 + $0x68] sm:$0xff] }
 0x179   :  { %4801 = vmatpush3.bf16.msra.mxu0 %v4800_v34  ;;  %4833 = vmatpush3.bf16.msra.mxu1 %v4832_v35  ;;  %v2499_v34 = vld [vmem:[%s6271_s2 + $0x70] sm:$0xff]  ;;  %v4854_v35 = vpack.c.bf16 %v2547_v32, %v2546_v30 }
 0x17a   :  { %4803 = vmatprep.subr.bf16.mxu0 %v4802_v38  ;;  %4835 = vmatprep.subr.bf16.mxu1 %v4834_v39  ;;  %v4824_v36 = vpack.c.bf16 %v2499_v34, %v2498_v33  ;;  %v2531_v38 = vld [vmem:[%s6271_s2 + $0x170] sm:$0xff]  ;;  %v2516_v39 = vld [vmem:[%s6271_s2 + $0xf8] sm:$0xff] }
 0x17b   :  { %v4856_v40 = vpack.c.bf16 %v2531_v38, %v2530_v37  ;;  %v4826_v44 = vpack.c.bf16 %v2517_v41, %v2516_v39 }
 0x17d   :  { %4805 = vmatpush3.bf16.msra.mxu0 %v4804_v46  ;;  %4837 = vmatpush3.bf16.msra.mxu1 %v4836_v47  ;;  %v2500_v46 = vld [vmem:[%s6271_s2 + $0x78] sm:$0xff]  ;;  %v2501_v47 = vld [vmem:[%s6271_s2 + $0x80] sm:$0xff] }
 0x17e   :  { %4807 = vmatprep.subr.bf16.mxu0 %v4806_v49  ;;  %4839 = vmatprep.subr.bf16.mxu1 %v4838_v50  ;;  %v4828_v49 = vpack.c.bf16 %v2501_v47, %v2500_v46  ;;  %v2533_v50 = vld [vmem:[%s6271_s2 + $0x180] sm:$0xff] }
 0x17f   :  { %v4860_v51 = vpack.c.bf16 %v2533_v50, %v2532_v48 }
 0x181   :  { %4809 = vmatpush3.bf16.msra.mxu0 %v4808_v54  ;;  %4841 = vmatpush3.bf16.msra.mxu1 %v4840_v55 }
 0x182   :  { %4811 = vmatprep.subr.bf16.mxu0 %v4810_v59  ;;  %4843 = vmatprep.subr.bf16.mxu1 %v4842_v63 }
 0x185   :  { %4813 = vmatpush3.bf16.msra.mxu0 %v4812_v0  ;;  %4845 = vmatpush3.bf16.msra.mxu1 %v4844_v3 }
 0x186   :  { %4815 = vmatprep.subr.bf16.mxu0 %v4814_v7  ;;  %4847 = vmatprep.subr.bf16.mxu1 %v4846_v11 }
 0x189   :  { %4817 = vmatpush3.bf16.msra.mxu0 %v4816_v12  ;;  %4849 = vmatpush3.bf16.msra.mxu1 %v4848_v15 }
 0x18a   :  { %4819 = vmatprep.subr.bf16.mxu0 %v4818_v19  ;;  %4851 = vmatprep.subr.bf16.mxu1 %v4850_v23 }
 0x18d   :  { %4821 = vmatpush3.bf16.msra.mxu0 %v4820_v24  ;;  %4853 = vmatpush3.bf16.msra.mxu1 %v4852_v27 }
 0x18e   :  { %4823 = vmatprep.subr.bf16.mxu0 %v4822_v31  ;;  %4855 = vmatprep.subr.bf16.mxu1 %v4854_v35 }
 0x191   :  { %4825 = vmatpush3.bf16.msra.mxu0 %v4824_v36  ;;  %4857 = vmatpush3.bf16.msra.mxu1 %v4856_v40 }
 0x192   :  { %4827 = vmatprep.subr.bf16.mxu0 %v4826_v44  ;;  %4859 = vmatprep.subr.bf16.mxu1 %v4858_v45 }
 0x195   :  { %4829 = vmatpush3.bf16.msra.mxu0 %v4828_v49  ;;  %4861 = vmatpush3.bf16.msra.mxu1 %v4860_v51 }
 0x24b   :  { %v5971_v54 = vpop.f32.mrb[0].mxu0  ;;  %v5973_v55 = vpop.f32.mrb[0].mxu1 }
 0x24c   :  { %v2421_v58 = vrot.slane %v5971_v54, 4  ;;  %v2445_v59 = vmul.f32 %v5971_v54, %v5971_v54  ;;  %v2433_v60 = vrot.slane %v5973_v55, 4  ;;  %v2447_v61 = vmul.f32 %v5973_v55, %v5973_v55  ;;  %v5984_v62 = vpop.f32.mrb[1].mxu0  ;;  %v5986_v63 = vpop.f32.mrb[1].mxu1 }
 0x24d   :  { %v2427_v0 = vrot.slane %v5984_v62, 4  ;;  %v2446_v1 = vmul.f32 %v5984_v62, %v5984_v62  ;;  %v2439_v2 = vrot.slane %v5986_v63, 4  ;;  %v2448_v3 = vmul.f32 %v5986_v63, %v5986_v63  ;;  %v2213_v4 = vpop.f32.mrb[2].mxu0  ;;  %v2418_v5 = vpop.f32.mrb[2].mxu1 }
 0x24e   :  { %v2422_v6 = vadd.f32 %v2421_v58, %v5971_v54  ;;  %v2449_v7 = vrot.slane %v2445_v59, 4  ;;  %v2434_v8 = vadd.f32 %v2433_v60, %v5973_v55  ;;  %v2461_v9 = vrot.slane %v2447_v61, 4  ;;  %v2214_v10 = vpop.f32.mrb[3].mxu0  ;;  %v2419_v11 = vpop.f32.mrb[3].mxu1 }
 0x24f   :  { %v2428_v12 = vadd.f32 %v2427_v0, %v5984_v62  ;;  %v2455_v13 = vrot.slane %v2446_v1, 4  ;;  %v2440_v14 = vadd.f32 %v2439_v2, %v5986_v63  ;;  %v2467_v15 = vrot.slane %v2448_v3, 4  ;;  %v2722_v10 = vld [vmem:[#allocation4 + $0x18] sm:$0xff] }
 0x250   :  { %v2423_v16 = vrot.slane %v2422_v6, 2  ;;  %v2450_v17 = vadd.f32 %v2449_v7, %v2445_v59  ;;  %v2435_v18 = vrot.slane %v2434_v8, 2  ;;  %v2462_v19 = vadd.f32 %v2461_v9, %v2447_v61  ;;  %v2719_v9 = vld [vmem:[#allocation4] sm:$0xff] }
 0x251   :  { %v2429_v20 = vrot.slane %v2428_v12, 2  ;;  %v2456_v21 = vadd.f32 %v2455_v13, %v2446_v1  ;;  %v2441_v22 = vrot.slane %v2440_v14, 2  ;;  %v2468_v23 = vadd.f32 %v2467_v15, %v2448_v3 }
 0x252   :  { %v2424_v24 = vadd.f32 %v2423_v16, %v2422_v6  ;;  %v2451_v25 = vrot.slane %v2450_v17, 2  ;;  %v2436_v26 = vadd.f32 %v2435_v18, %v2434_v8  ;;  %v2463_v27 = vrot.slane %v2462_v19, 2  ;;  %v2720_v8 = vld [vmem:[#allocation4 + $0x8] sm:$0xff] }
 0x253   :  { %v2430_v28 = vadd.f32 %v2429_v20, %v2428_v12  ;;  %v2457_v29 = vrot.slane %v2456_v21, 2  ;;  %v2442_v30 = vadd.f32 %v2441_v22, %v2440_v14  ;;  %v2469_v31 = vrot.slane %v2468_v23, 2  ;;  %2727 = vmatprep.subr.mxu0 %v2720_v8  ;;  %v5516_v8 = vld [vmem:[#allocation2 + $0xb80] ss:$16 sps:$4 sm:$0xff]  }
 0x254   :  { %v2425_v32 = vrot.slane %v2424_v24, 1  ;;  %v2452_v33 = vadd.f32 %v2451_v25, %v2450_v17  ;;  %v2437_v34 = vrot.slane %v2436_v26, 1  ;;  %v2464_v35 = vadd.f32 %v2463_v27, %v2462_v19  ;;  %v2485_v25 = vld [vmem:[%s6271_s2] sm:$0x3] }
 0x255   :  { %v2431_v36 = vrot.slane %v2430_v28, 1  ;;  %v2458_v37 = vadd.f32 %v2457_v29, %v2456_v21  ;;  %v2443_v38 = vrot.slane %v2442_v30, 1  ;;  %v2470_v39 = vadd.f32 %v2469_v31, %v2468_v23 }
 0x256   :  { %v2453_v40 = vrot.slane %v2452_v33, 1  ;;  %v2465_v41 = vrot.slane %v2464_v35, 1  ;;  %v2426_v47 = vadd.f32 %v2425_v32, %v2424_v24  ;;  %v2438_v48 = vadd.f32 %v2437_v34, %v2436_v26 }
 0x257   :  { %v2432_v43 = vadd.f32 %v2431_v36, %v2430_v28  ;;  %v2459_v44 = vrot.slane %v2458_v37, 1  ;;  %v2444_v45 = vadd.f32 %v2443_v38, %v2442_v30  ;;  %v2471_v46 = vrot.slane %v2470_v39, 1  ;;  %v2721_v38 = vld [vmem:[#allocation4 + $0x10] sm:$0xff] }
 0x258   :  { %v2454_v49 = vadd.f32 %v2453_v40, %v2452_v33  ;;  %v2466_v50 = vadd.f32 %v2465_v41, %v2464_v35  ;;  %v2473_v2 = vmul.f32 %v5976_v57, %v2426_v47  ;;  %v2475_v3 = vmul.f32 %v5976_v57, %v2438_v48  ;;  %v5480_v40 = vld [vmem:[#allocation2 + $0xa00] ss:$16 sps:$4 sm:$0xff]   ;;  %v5485_v41 = vld [vmem:[#allocation2 + $0xa24] ss:$16 sps:$4 sm:$0xff]  }
 0x259   :  { %v2460_v51 = vadd.f32 %v2459_v44, %v2458_v37  ;;  %v2472_v52 = vadd.f32 %v2471_v46, %v2470_v39  ;;  %v2474_v60 = vmul.f32 %v5976_v57, %v2432_v43  ;;  %v2476_v0 = vmul.f32 %v5976_v57, %v2444_v45  ;;  %v5482_v39 = vld [vmem:[#allocation2 + $0xa04] ss:$16 sps:$4 sm:$0xff]   ;;  %v5483_v43 = vld [vmem:[#allocation2 + $0xa20] ss:$16 sps:$4 sm:$0xff]  }
 0x25a   :  { %v2477_v58 = vmul.f32 %v2454_v49, %v5999_v42  ;;  %v2479_v59 = vmul.f32 %v2466_v50, %v5999_v42  ;;  %v6014_v28 = vsub.s32 0, %v5968_v53  ;;  %v6017_v30 = vsub.s32 1, %v5968_v53  ;;  %v5488_v44 = vld [vmem:[#allocation2 + $0xa44] ss:$16 sps:$4 sm:$0xff]   ;;  %v5486_v45 = vld [vmem:[#allocation2 + $0xa40] ss:$16 sps:$4 sm:$0xff]  }
 0x25b   :  { %v2478_v61 = vmul.f32 %v2460_v51, %v5999_v42  ;;  %v2480_v1 = vmul.f32 %v2472_v52, %v5999_v42  ;;  %v5491_v46 = vld [vmem:[#allocation2 + $0xa64] ss:$16 sps:$4 sm:$0xff]   ;;  %v5489_v47 = vld [vmem:[#allocation2 + $0xa60] ss:$16 sps:$4 sm:$0xff]  }
 0x25c   :  { %v2481_v6 = vadd.f32 %v2477_v58, %v2473_v2  ;;  %v2483_v7 = vadd.f32 %v2479_v59, %v2475_v3  ;;  %v5494_v48 = vld [vmem:[#allocation2 + $0xa84] ss:$16 sps:$4 sm:$0xff]   ;;  %v5492_v49 = vld [vmem:[#allocation2 + $0xa80] ss:$16 sps:$4 sm:$0xff]  }
 0x25d   :  { %v2482_v4 = vadd.f32 %v2478_v61, %v2474_v60  ;;  %v2484_v5 = vadd.f32 %v2480_v1, %v2476_v0  ;;  %v5497_v50 = vld [vmem:[#allocation2 + $0xaa4] ss:$16 sps:$4 sm:$0xff]   ;;  %v5495_v51 = vld [vmem:[#allocation2 + $0xaa0] ss:$16 sps:$4 sm:$0xff]  }
 0x25e   :  { %v5500_v52 = vld [vmem:[#allocation2 + $0xac4] ss:$16 sps:$4 sm:$0xff]   ;;  %v5498_v58 = vld [vmem:[#allocation2 + $0xac0] ss:$16 sps:$4 sm:$0xff]  }
 0x25f   :  { %2614 = vmatprep.mubr.f32.mxu0 %v2482_v4  ;;  %2684 = vmatprep.mubr.f32.mxu1 %v2484_v5  ;;  %v5503_v59 = vld [vmem:[#allocation2 + $0xae4] ss:$16 sps:$4 sm:$0xff]   ;;  %v5501_v60 = vld [vmem:[#allocation2 + $0xae0] ss:$16 sps:$4 sm:$0xff]  }
 0x260   :  { %2615 = vmatmul.mubr.f32.vlgmr.msra.gmra.mrb[4].mxu0 %v2481_v6  ;;  %2685 = vmatmul.mubr.f32.vlgmr.msra.gmra.mrb[4].mxu1 %v2483_v7  ;;  %v5506_v61 = vld [vmem:[#allocation2 + $0xb04] ss:$16 sps:$4 sm:$0xff]   ;;  %v5504_v0 = vld [vmem:[#allocation2 + $0xb00] ss:$16 sps:$4 sm:$0xff]  }
 0x261   :  { %2791 = vmatprep.mubr.f32.mxu0 %v5677_v56  ;;  %2728 = vmatpush1.msra.mxu0 %v2719_v9  ;;  %v5509_v1 = vld [vmem:[#allocation2 + $0xb24] ss:$16 sps:$4 sm:$0xff]   ;;  %v5507_v2 = vld [vmem:[#allocation2 + $0xb20] ss:$16 sps:$4 sm:$0xff]  }
 0x262   :  { %2798 = vmatprep.subr.mxu0 %v2722_v10  ;;  %v5512_v3 = vld [vmem:[#allocation2 + $0xb44] ss:$16 sps:$4 sm:$0xff]   ;;  %v5510_v4 = vld [vmem:[#allocation2 + $0xb40] ss:$16 sps:$4 sm:$0xff]  }
 0x263   :  { %v5515_v5 = vld [vmem:[#allocation2 + $0xb64] ss:$16 sps:$4 sm:$0xff]   ;;  %v5513_v6 = vld [vmem:[#allocation2 + $0xb60] ss:$16 sps:$4 sm:$0xff]  }
 0x264   :  { %v5518_v7 = vld [vmem:[#allocation2 + $0xb84] ss:$16 sps:$4 sm:$0xff]   ;;  %v5519_v10 = vld [vmem:[#allocation2 + $0xba0] ss:$16 sps:$4 sm:$0xff]  }
 0x265   :  { %v5521_v9 = vld [vmem:[#allocation2 + $0xba4] ss:$16 sps:$4 sm:$0xff]  }
 0x333   :  { %v4583_v11 = vpop.f32.mrb[4].mxu0  ;;  %v4618_v12 = vpop.f32.mrb[4].mxu1 }
 0x334   :  { %v4584_v13 = vpop.f32.mrb[5].mxu0  ;;  %v4619_v14 = vpop.f32.mrb[5].mxu1 }
 0x335   :  { %v4585_v15 = vadd.f32 %v4584_v13, %v4583_v11  ;;  %v4620_v16 = vadd.f32 %v4619_v14, %v4618_v12  ;;  %v5524_v11 = vld [vmem:[#allocation2 + $0xbc4] ss:$16 sps:$4 sm:$0xff]   ;;  %v5522_v12 = vld [vmem:[#allocation2 + $0xbc0] ss:$16 sps:$4 sm:$0xff]  }
 0x336   :  { %v5527_v13 = vld [vmem:[#allocation2 + $0xbe4] ss:$16 sps:$4 sm:$0xff]   ;;  %v5525_v14 = vld [vmem:[#allocation2 + $0xbe0] ss:$16 sps:$4 sm:$0xff]  }
 0x337   :  { %v2687_v17 = vadd.f32 %v4620_v16, %v4585_v15  ;;  %v5530_v15 = vld [vmem:[#allocation2 + $0xc04] ss:$16 sps:$4 sm:$0xff]  }
 0x338   :  { %v3436_v16 = vld [vmem:[%s6271_s2 + $0x290] sm:$0xff] }
 0x339   :  { %v2690_v18 = vmul.f32 0.0078125, %v2687_v17  ;;  %v3437_v17 = vld [vmem:[%s6271_s2 + $0x298] sm:$0xff] }
 0x33b   :  { %v2691_v19 = vmul.f32 %v2690_v18, %v2690_v18 }
 0x33d   :  { %v2693_v20 = vrot.slane %v2691_v19, 7  ;;  %v4862_v19 = vpack.c.bf16 %v3437_v17, %v3436_v16  ;;  %v5548_v16 = vld [vmem:[#allocation2 + $0xcc4] ss:$16 sps:$4 sm:$0xff]   ;;  %v5546_v17 = vld [vmem:[#allocation2 + $0xcc0] ss:$16 sps:$4 sm:$0xff]  }
 0x33f   :  { %v2695_v21 = vsub.f32 %v2690_v18, %v2693_v20  ;;  %v3421_v20 = vld [vmem:[%s6271_s2 + $0x218] sm:$0xff]  ;;  %4863 = vmatprep.subr.bf16.mxu1 %v4862_v19  ;;  %v5549_v19 = vld [vmem:[#allocation2 + $0xce0] ss:$16 sps:$4 sm:$0xff]  }
 0x341   :  { %v2696_v22 = vmax.f32 %v2695_v21, 0.0  ;;  %v3438_v21 = vld [vmem:[%s6271_s2 + $0x2a0] sm:$0xff] }
 0x343   :  { %v2697_v23 = vadd.f32 1e-05, %v2696_v22  ;;  %v3439_v22 = vld [vmem:[%s6271_s2 + $0x2a8] sm:$0xff] }
 0x345   :  { %5592 = vrsqrt.f32 %v2697_v23 }
 0x34f   :  { %v5593_v24 = vpop.eup %5592 }
 0x350   :  { %v2700_v26 = vrot.slane %v5593_v24, 1  ;;  %v4866_v24 = vpack.c.bf16 %v3439_v22, %v3438_v21  ;;  %v5552_v21 = vld [vmem:[#allocation2 + $0xd00] ss:$16 sps:$4 sm:$0xff]   ;;  %v5557_v22 = vld [vmem:[#allocation2 + $0xd24] ss:$16 sps:$4 sm:$0xff]  }
 0x352   :  { %v2702_v27 = vmul.f32 %v2700_v26, %v2485_v25  ;;  %v3423_v26 = vld [vmem:[%s6271_s2 + $0x228] sm:$0xff] }
 0x354   :  { %v2703_v29 = vmul.f32 %v2702_v27, %v2690_v18  ;;  %v2711_v33 = vrot.slane %v2702_v27, %v6014_v28  ;;  %v3420_v18 = vld [vmem:[%s6271_s2 + $0x210] sm:$0xff] }
 0x355   :  { %v4864_v23 = vpack.c.bf16 %v3421_v20, %v3420_v18  ;;  %v3440_v27 = vld [vmem:[%s6271_s2 + $0x2b0] sm:$0xff] }
 0x356   :  { %v2705_v31 = vrot.slane %v2703_v29, 7  ;;  %v2712_v35 = vmul.f32 %v5976_v57, %v2711_v33  ;;  %v3441_v29 = vld [vmem:[%s6271_s2 + $0x2b8] sm:$0xff]  ;;  %v3424_v33 = vld [vmem:[%s6271_s2 + $0x230] sm:$0xff] }
 0x357   :  { %4865 = vmatpush3.bf16.msra.mxu1 %v4864_v23  ;;  %v5551_v18 = vld [vmem:[#allocation2 + $0xce4] ss:$16 sps:$4 sm:$0xff]   ;;  %v5555_v23 = vld [vmem:[#allocation2 + $0xd20] ss:$16 sps:$4 sm:$0xff]  }
 0x358   :  { %v2707_v32 = vsub.f32 %v2485_v25, %v2705_v31  ;;  %v3422_v25 = vld [vmem:[%s6271_s2 + $0x220] sm:$0xff]  ;;  %4867 = vmatprep.subr.bf16.mxu1 %v4866_v24 }
 0x359   :  { %v4868_v31 = vpack.c.bf16 %v3423_v26, %v3422_v25  ;;  %v5554_v20 = vld [vmem:[#allocation2 + $0xd04] ss:$16 sps:$4 sm:$0xff]   ;;  %v5558_v25 = vld [vmem:[#allocation2 + $0xd40] ss:$16 sps:$4 sm:$0xff]  }
 0x35a   :  { %v2716_v34 = vrot.slane %v2707_v32, %v6017_v30  ;;  %v4870_v32 = vpack.c.bf16 %v3441_v29, %v3440_v27  ;;  %v5560_v24 = vld [vmem:[#allocation2 + $0xd44] ss:$16 sps:$4 sm:$0xff]   ;;  %v5561_v27 = vld [vmem:[#allocation2 + $0xd60] ss:$16 sps:$4 sm:$0xff]  }
 0x35b   :  { %4869 = vmatpush3.bf16.msra.mxu1 %v4868_v31  ;;  %v5563_v26 = vld [vmem:[#allocation2 + $0xd64] ss:$16 sps:$4 sm:$0xff]   ;;  %v5564_v31 = vld [vmem:[#allocation2 + $0xd80] ss:$16 sps:$4 sm:$0xff]  }
 0x35c   :  { %v2717_v36 = vmul.f32 %v2716_v34, %v5999_v42  ;;  %v3425_v34 = vld [vmem:[%s6271_s2 + $0x238] sm:$0xff]  ;;  %4871 = vmatprep.subr.bf16.mxu1 %v4870_v32  ;;  %v5566_v29 = vld [vmem:[#allocation2 + $0xd84] ss:$16 sps:$4 sm:$0xff]  }
 0x35d   :  { %v5569_v32 = vld [vmem:[#allocation2 + $0xda4] ss:$16 sps:$4 sm:$0xff]  }
 0x35e   :  { %v2718_v37 = vadd.f32 %v2717_v36, %v2712_v35  ;;  %v4872_v35 = vpack.c.bf16 %v3425_v34, %v3424_v33  ;;  %v5567_v33 = vld [vmem:[#allocation2 + $0xda0] ss:$16 sps:$4 sm:$0xff]   ;;  %v5572_v34 = vld [vmem:[#allocation2 + $0xdc4] ss:$16 sps:$4 sm:$0xff]  }
 0x360   :  { %4466 = vmatmul.mubr.msk.f32.vlgmr.msra.gmra.mrb[6].mxu0 %vm2723_vm1, %v2718_v37  ;;  %4873 = vmatpush3.bf16.msra.mxu1 %v4872_v35  ;;  %v5570_v35 = vld [vmem:[#allocation2 + $0xdc0] ss:$16 sps:$4 sm:$0xff]  }
 0x361   :  { %2799 = vmatpush1.msra.mxu0 %v2721_v38  ;;  %2862 = vmatprep.mubr.f32.mxu0 %v5677_v56 }
 0x362   :  { %3305 = vmatprep.subr.bf16.mxu0 %v5482_v39 }
 0x364   :  { %4467 = vmatmul.mubr.msk.f32.vlgmr.msra.gmra.mrb[8].mxu0 %vm2723_vm1, %v2718_v37 }
 0x365   :  { %3306 = vmatpush1.bf16.msra.mxu0 %v5480_v40 }
 0x366   :  { %3307 = vmatprep.subr.bf16.mxu0 %v5485_v41 }
 0x369   :  { %3308 = vmatpush1.bf16.msra.mxu0 %v5483_v43 }
 0x36a   :  { %3309 = vmatprep.subr.bf16.mxu0 %v5488_v44 }
 0x36d   :  { %3310 = vmatpush1.bf16.msra.mxu0 %v5486_v45 }
 0x36e   :  { %3311 = vmatprep.subr.bf16.mxu0 %v5491_v46 }
 0x371   :  { %3312 = vmatpush1.bf16.msra.mxu0 %v5489_v47 }
 0x372   :  { %3313 = vmatprep.subr.bf16.mxu0 %v5494_v48 }
 0x375   :  { %3314 = vmatpush1.bf16.msra.mxu0 %v5492_v49  ;;  %v6069_v49 = vsel %vm68_vm2, 1.0, %v5677_v56 }
 0x376   :  { %3315 = vmatprep.subr.bf16.mxu0 %v5497_v50 }
 0x379   :  { %3316 = vmatpush1.bf16.msra.mxu0 %v5495_v51 }
 0x37a   :  { %3317 = vmatprep.subr.bf16.mxu0 %v5500_v52 }
 0x37d   :  { %3318 = vmatpush1.bf16.msra.mxu0 %v5498_v58 }
 0x37e   :  { %3319 = vmatprep.subr.bf16.mxu0 %v5503_v59 }
 0x381   :  { %3320 = vmatpush1.bf16.msra.mxu0 %v5501_v60 }
 0x382   :  { %3321 = vmatprep.subr.bf16.mxu0 %v5506_v61 }
 0x385   :  { %3322 = vmatpush1.bf16.msra.mxu0 %v5504_v0 }
 0x386   :  { %3323 = vmatprep.subr.bf16.mxu0 %v5509_v1 }
 0x389   :  { %3324 = vmatpush1.bf16.msra.mxu0 %v5507_v2 }
 0x38a   :  { %3325 = vmatprep.subr.bf16.mxu0 %v5512_v3 }
 0x38d   :  { %3326 = vmatpush1.bf16.msra.mxu0 %v5510_v4  ;;  %v5528_v4 = vld [vmem:[#allocation2 + $0xc00] ss:$16 sps:$4 sm:$0xff]  }
 0x38e   :  { %3327 = vmatprep.subr.bf16.mxu0 %v5515_v5 }
 0x391   :  { %3328 = vmatpush1.bf16.msra.mxu0 %v5513_v6  ;;  %v5533_v6 = vld [vmem:[#allocation2 + $0xc24] ss:$16 sps:$4 sm:$0xff]  }
 0x392   :  { %3329 = vmatprep.subr.bf16.mxu0 %v5518_v7 }
 0x395   :  { %3330 = vmatpush1.bf16.msra.mxu0 %v5516_v8  ;;  %v5536_v8 = vld [vmem:[#allocation2 + $0xc44] ss:$16 sps:$4 sm:$0xff]  }
 0x396   :  { %3331 = vmatprep.subr.bf16.mxu0 %v5521_v9  ;;  %v5534_v9 = vld [vmem:[#allocation2 + $0xc40] ss:$16 sps:$4 sm:$0xff]  }
 0x399   :  { %3332 = vmatpush1.bf16.msra.mxu0 %v5519_v10  ;;  %v5539_v10 = vld [vmem:[#allocation2 + $0xc64] ss:$16 sps:$4 sm:$0xff]  }
 0x39a   :  { %3333 = vmatprep.subr.bf16.mxu0 %v5524_v11  ;;  %v5537_v11 = vld [vmem:[#allocation2 + $0xc60] ss:$16 sps:$4 sm:$0xff]  }
 0x39d   :  { %3334 = vmatpush1.bf16.msra.mxu0 %v5522_v12  ;;  %v5542_v12 = vld [vmem:[#allocation2 + $0xc84] ss:$16 sps:$4 sm:$0xff]  }
 0x39e   :  { %3335 = vmatprep.subr.bf16.mxu0 %v5527_v13  ;;  %v5540_v13 = vld [vmem:[#allocation2 + $0xc80] ss:$16 sps:$4 sm:$0xff]  }
 0x3a1   :  { %3336 = vmatpush1.bf16.msra.mxu0 %v5525_v14  ;;  %v5545_v14 = vld [vmem:[#allocation2 + $0xca4] ss:$16 sps:$4 sm:$0xff]  }
 0x3a2   :  { %3346 = vmatprep.subr.bf16.mxu0 %v5530_v15  ;;  %v5543_v15 = vld [vmem:[#allocation2 + $0xca0] ss:$16 sps:$4 sm:$0xff]  }
 0x433   :  { %v2793_v36 = vpop.f32.mrb[6].mxu0 }
 0x434   :  { %v2872_v37 = vrot.slane %v2793_v36, %v6014_v28  ;;  %v2795_v38 = vpop.f32.mrb[7].mxu0  ;;  %v2892_v41 = vrot.slane %v2793_v36, %v6017_v30 }
 0x435   :  { %v2876_v39 = vrot.slane %v2795_v38, %v6014_v28  ;;  %v2896_v44 = vrot.slane %v2795_v38, %v6017_v30  ;;  %v5573_v38 = vld [vmem:[#allocation2 + $0xde0] ss:$16 sps:$4 sm:$0xff]  }
 0x436   :  { %v2885_v40 = vmul.f32 %v2872_v37, %v5971_v54  ;;  %v5575_v37 = vld [vmem:[#allocation2 + $0xde4] ss:$16 sps:$4 sm:$0xff]  }
 0x437   :  { %v2886_v43 = vmul.f32 %v2876_v39, %v5984_v62  ;;  %v2864_v45 = vpop.f32.mrb[8].mxu0 }
 0x438   :  { %v2905_v46 = vadd.f32 %v2892_v41, %v2885_v40  ;;  %v2880_v47 = vrot.slane %v2864_v45, %v6014_v28  ;;  %v2866_v48 = vpop.f32.mrb[9].mxu0  ;;  %v2900_v52 = vrot.slane %v2864_v45, %v6017_v30  ;;  %v3442_v41 = vld [vmem:[%s6271_s2 + $0x2c0] sm:$0xff] }
 0x439   :  { %v2906_v50 = vadd.f32 %v2896_v44, %v2886_v43  ;;  %v2884_v51 = vrot.slane %v2866_v48, %v6014_v28  ;;  %v2904_v59 = vrot.slane %v2866_v48, %v6017_v30  ;;  %v3443_v43 = vld [vmem:[%s6271_s2 + $0x2c8] sm:$0xff]  ;;  %v3426_v45 = vld [vmem:[%s6271_s2 + $0x240] sm:$0xff]  ;;  %v3444_v48 = vld [vmem:[%s6271_s2 + $0x2d0] sm:$0xff] }
 0x43a   :  { %v2909_v53 = vmax.f32 %v2905_v46, 0.0  ;;  %v2887_v54 = vmul.f32 %v2880_v47, %v5973_v55  ;;  %v4874_v44 = vpack.c.bf16 %v3443_v43, %v3442_v41  ;;  %v3427_v46 = vld [vmem:[%s6271_s2 + $0x248] sm:$0xff] }
 0x43b   :  { %v2910_v58 = vmax.f32 %v2906_v50, 0.0  ;;  %v2888_v62 = vmul.f32 %v2884_v51, %v5986_v63  ;;  %v5531_v63 = vld [vmem:[#allocation2 + $0xc20] ss:$16 sps:$4 sm:$0xff]   ;;  %v4876_v47 = vpack.c.bf16 %v3427_v46, %v3426_v45  ;;  %v3445_v50 = vld [vmem:[%s6271_s2 + $0x2d8] sm:$0xff] }
 0x43c   :  { %v2913_v60 = vmul.f32 %v6069_v49, %v2909_v53  ;;  %v6077_v61 = vadd.f32 %v2900_v52, %v2887_v54  ;;  %4875 = vmatprep.subr.bf16.mxu1 %v4874_v44  ;;  %v4878_v51 = vpack.c.bf16 %v3445_v50, %v3444_v48  ;;  %v3428_v53 = vld [vmem:[%s6271_s2 + $0x250] sm:$0xff]  ;;  %v3429_v54 = vld [vmem:[%s6271_s2 + $0x258] sm:$0xff] }
 0x43d   :  { %v2908_v0 = vadd.f32 %v2904_v59, %v2888_v62  ;;  %v2914_v1 = vmul.f32 %v6069_v49, %v2910_v58  ;;  %4877 = vmatpush3.bf16.msra.mxu1 %v4876_v47  ;;  %v4880_v52 = vpack.c.bf16 %v3429_v54, %v3428_v53  ;;  %v3446_v58 = vld [vmem:[%s6271_s2 + $0x2e0] sm:$0xff]  ;;  %v3447_v62 = vld [vmem:[%s6271_s2 + $0x2e8] sm:$0xff] }
 0x43e   :  { %v2981_v5 = vpack.c.bf16 %v2913_v60, %v2913_v60  ;;  %v2911_v36 = vmax.f32 %v6077_v61, 0.0  ;;  %4879 = vmatprep.subr.bf16.mxu1 %v4878_v51  ;;  %v4882_v59 = vpack.c.bf16 %v3447_v62, %v3446_v58  ;;  %v3430_v60 = vld [vmem:[%s6271_s2 + $0x260] sm:$0xff]  ;;  %v3431_v61 = vld [vmem:[%s6271_s2 + $0x268] sm:$0xff] }
 0x43f   :  { %v2912_v2 = vmax.f32 %v2908_v0, 0.0  ;;  %v2982_v3 = vpack.c.bf16 %v2914_v1, %v2914_v1  ;;  %v4884_v0 = vpack.c.bf16 %v3431_v61, %v3430_v60  ;;  %v3448_v1 = vld [vmem:[%s6271_s2 + $0x2f0] sm:$0xff]  ;;  %v3552_v51 = vld [vmem:[#allocation4 + $0x28] sm:$0xff]  ;;  %v3553_v58 = vld [vmem:[#allocation4 + $0x40] sm:$0xff] }
 0x440   :  { %v2915_v39 = vmul.f32 %v6069_v49, %v2911_v36  ;;  %v3554_v53 = vld [vmem:[#allocation4 + $0x48] sm:$0xff] }
 0x441   :  { %3337 = vmatprep.mubr.bf16.mxu0 %v2982_v3  ;;  %v2916_v55 = vmul.f32 %v6069_v49, %v2912_v2  ;;  %4881 = vmatpush3.bf16.msra.mxu1 %v4880_v52  ;;  %v3449_v2 = vld [vmem:[%s6271_s2 + $0x2f8] sm:$0xff]  ;;  %v4894_v54 = vpack.c.bf16 %v3554_v53, %v3552_v51  ;;  %v3551_v52 = vld [vmem:[#allocation4 + $0x20] sm:$0xff] }
 0x442   :  { %3338 = vmatmul.mubr.bf16.vlgmr.msra.gmra.mrb[12].mxu0 %v2981_v5  ;;  %v2983_v40 = vpack.c.bf16 %v2915_v39, %v2915_v39  ;;  %4883 = vmatprep.subr.bf16.mxu1 %v4882_v59  ;;  %v4886_v3 = vpack.c.bf16 %v3449_v2, %v3448_v1  ;;  %v3433_v5 = vld [vmem:[%s6271_s2 + $0x278] sm:$0xff]  ;;  %v4896_v62 = vpack.c.bf16 %v3553_v58, %v3551_v52  ;;  %v5576_v59 = vld [vmem:[#allocation2 + $0xf00] ss:$16 sps:$4 sm:$0xff]  }
 0x443   :  { %3347 = vmatpush1.bf16.msra.mxu0 %v5528_v4  ;;  %v2984_v7 = vpack.c.bf16 %v2916_v55, %v2916_v55  ;;  %v3432_v4 = vld [vmem:[%s6271_s2 + $0x270] sm:$0xff]  ;;  %v3841_v53 = vld [vmem:[%s6271_s2 + $0x318] sm:$0xff] }
 0x444   :  { %3348 = vmatprep.subr.bf16.mxu0 %v5533_v6  ;;  %v3450_v6 = vld [vmem:[%s6271_s2 + $0x300] sm:$0xff]  ;;  %v4888_v55 = vpack.c.bf16 %v3433_v5, %v3432_v4 }
 0x445   :  { %3378 = vmatprep.mubr.bf16.mxu0 %v2984_v7  ;;  %4885 = vmatpush3.bf16.msra.mxu1 %v4884_v0  ;;  %v3434_v7 = vld [vmem:[%s6271_s2 + $0x280] sm:$0xff] }
 0x446   :  { %4887 = vmatprep.subr.bf16.mxu1 %v4886_v3 }
 0x447   :  { %3349 = vmatpush1.bf16.msra.mxu0 %v5531_v63  ;;  %v3451_v63 = vld [vmem:[%s6271_s2 + $0x308] sm:$0xff] }
 0x448   :  { %3350 = vmatprep.subr.bf16.mxu0 %v5536_v8  ;;  %v3435_v8 = vld [vmem:[%s6271_s2 + $0x288] sm:$0xff] }
 0x449   :  { %4889 = vmatpush3.bf16.msra.mxu1 %v4888_v55 }
 0x44b   :  { %3351 = vmatpush1.bf16.msra.mxu0 %v5534_v9  ;;  %v4890_v9 = vpack.c.bf16 %v3451_v63, %v3450_v6  ;;  %v3419_v63 = vld [vmem:[%s6271_s2 + $0x208] sm:$0x3] }
 0x44c   :  { %3352 = vmatprep.subr.bf16.mxu0 %v5539_v10  ;;  %v4892_v10 = vpack.c.bf16 %v3435_v8, %v3434_v7 }
 0x44d   :  { %4891 = vmatprep.subr.bf16.mxu1 %v4890_v9 }
 0x44e   :  { %4893 = vmatpush3.bf16.msra.mxu1 %v4892_v10 }
 0x44f   :  { %3353 = vmatpush1.bf16.msra.mxu0 %v5537_v11  ;;  %4895 = vmatprep.subr.bf16.mxu1 %v4894_v54 }
 0x450   :  { %3354 = vmatprep.subr.bf16.mxu0 %v5542_v12 }
 0x453   :  { %3355 = vmatpush1.bf16.msra.mxu0 %v5540_v13 }
 0x454   :  { %3356 = vmatprep.subr.bf16.mxu0 %v5545_v14 }
 0x457   :  { %3357 = vmatpush1.bf16.msra.mxu0 %v5543_v15 }
 0x458   :  { %3358 = vmatprep.subr.bf16.mxu0 %v5548_v16 }
 0x45b   :  { %3359 = vmatpush1.bf16.msra.mxu0 %v5546_v17 }
 0x45c   :  { %3360 = vmatprep.subr.bf16.mxu0 %v5551_v18 }
 0x45f   :  { %3361 = vmatpush1.bf16.msra.mxu0 %v5549_v19 }
 0x460   :  { %3362 = vmatprep.subr.bf16.mxu0 %v5554_v20 }
 0x463   :  { %3363 = vmatpush1.bf16.msra.mxu0 %v5552_v21 }
 0x464   :  { %3364 = vmatprep.subr.bf16.mxu0 %v5557_v22 }
 0x467   :  { %3365 = vmatpush1.bf16.msra.mxu0 %v5555_v23 }
 0x468   :  { %3366 = vmatprep.subr.bf16.mxu0 %v5560_v24 }
 0x46b   :  { %3367 = vmatpush1.bf16.msra.mxu0 %v5558_v25 }
 0x46c   :  { %3368 = vmatprep.subr.bf16.mxu0 %v5563_v26 }
 0x46f   :  { %3369 = vmatpush1.bf16.msra.mxu0 %v5561_v27 }
 0x470   :  { %3370 = vmatprep.subr.bf16.mxu0 %v5566_v29 }
 0x473   :  { %3371 = vmatpush1.bf16.msra.mxu0 %v5564_v31 }
 0x474   :  { %3372 = vmatprep.subr.bf16.mxu0 %v5569_v32 }
 0x477   :  { %3373 = vmatpush1.bf16.msra.mxu0 %v5567_v33 }
 0x478   :  { %3374 = vmatprep.subr.bf16.mxu0 %v5572_v34 }
 0x47b   :  { %3375 = vmatpush1.bf16.msra.mxu0 %v5570_v35 }
 0x47c   :  { %3376 = vmatprep.subr.bf16.mxu0 %v5575_v37 }
 0x47f   :  { %3377 = vmatpush1.bf16.msra.mxu0 %v5573_v38 }
 0x482   :  { %3379 = vmatmul.mubr.bf16.vlgmr.msra.gmra.mrb[12].mxu0 %v2983_v40 }
 0x555   :  { %v6143_v11 = vpop.f32.mrb[12].mxu0 }
 0x556   :  { %v3387_v12 = vrot.slane %v6143_v11, 4  ;;  %v3399_v13 = vmul.f32 %v6143_v11, %v6143_v11  ;;  %v6148_v14 = vpop.f32.mrb[13].mxu0 }
 0x557   :  { %v3393_v15 = vrot.slane %v6148_v14, 4  ;;  %v3400_v16 = vmul.f32 %v6148_v14, %v6148_v14  ;;  %v3384_v17 = vpop.f32.mrb[14].mxu0 }
 0x558   :  { %v3388_v18 = vadd.f32 %v3387_v12, %v6143_v11  ;;  %v3401_v19 = vrot.slane %v3399_v13, 4  ;;  %v3385_v20 = vpop.f32.mrb[15].mxu0 }
 0x559   :  { %v3394_v21 = vadd.f32 %v3393_v15, %v6148_v14  ;;  %v3407_v22 = vrot.slane %v3400_v16, 4  ;;  %v5578_v20 = vld [vmem:[#allocation2 + $0xf20] ss:$16 sps:$4 sm:$0xff]  }
 0x55a   :  { %v3389_v23 = vrot.slane %v3388_v18, 2  ;;  %v3402_v24 = vadd.f32 %v3401_v19, %v3399_v13 }
 0x55b   :  { %v3395_v25 = vrot.slane %v3394_v21, 2  ;;  %v3408_v26 = vadd.f32 %v3407_v22, %v3400_v16  ;;  %v5580_v22 = vld [vmem:[#allocation2 + $0xf40] ss:$16 sps:$4 sm:$0xff]  }
 0x55c   :  { %v3390_v27 = vadd.f32 %v3389_v23, %v3388_v18  ;;  %v3403_v29 = vrot.slane %v3402_v24, 2  ;;  %v5577_v18 = vld [vmem:[#allocation2 + $0xe00] ss:$16 sps:$4 sm:$0xff]  }
 0x55d   :  { %v3396_v31 = vadd.f32 %v3395_v25, %v3394_v21  ;;  %v3409_v32 = vrot.slane %v3408_v26, 2  ;;  %v5579_v21 = vld [vmem:[#allocation2 + $0xe20] ss:$16 sps:$4 sm:$0xff]  }
 0x55e   :  { %v3391_v33 = vrot.slane %v3390_v27, 1  ;;  %v3404_v34 = vadd.f32 %v3403_v29, %v3402_v24  ;;  %v5581_v23 = vld [vmem:[#allocation2 + $0xe40] ss:$16 sps:$4 sm:$0xff]  }
 0x55f   :  { %v3397_v35 = vrot.slane %v3396_v31, 1  ;;  %v3410_v36 = vadd.f32 %v3409_v32, %v3408_v26  ;;  %v5582_v24 = vld [vmem:[#allocation2 + $0xf60] ss:$16 sps:$4 sm:$0xff]  }
 0x560   :  { %v3405_v37 = vrot.slane %v3404_v34, 1  ;;  %v3392_v40 = vadd.f32 %v3391_v33, %v3390_v27  ;;  %v5583_v25 = vld [vmem:[#allocation2 + $0xe60] ss:$16 sps:$4 sm:$0xff]  }
 0x561   :  { %v3398_v38 = vadd.f32 %v3397_v35, %v3396_v31  ;;  %v3411_v39 = vrot.slane %v3410_v36, 1  ;;  %v5584_v26 = vld [vmem:[#allocation2 + $0xf80] ss:$16 sps:$4 sm:$0xff]  }
 0x562   :  { %v3406_v41 = vadd.f32 %v3405_v37, %v3404_v34  ;;  %v3413_v47 = vmul.f32 %v5976_v57, %v3392_v40  ;;  %v5585_v27 = vld [vmem:[#allocation2 + $0xe80] ss:$16 sps:$4 sm:$0xff]  }
 0x563   :  { %v3412_v43 = vadd.f32 %v3411_v39, %v3410_v36  ;;  %v3414_v45 = vmul.f32 %v5976_v57, %v3398_v38  ;;  %v5586_v29 = vld [vmem:[#allocation2 + $0xfa0] ss:$16 sps:$4 sm:$0xff]   ;;  %v5678_v36 = vmov 0.0|0.0  }
 0x564   :  { %v3415_v44 = vmul.f32 %v3406_v41, %v5999_v42  ;;  %v5587_v31 = vld [vmem:[#allocation2 + $0xea0] ss:$16 sps:$4 sm:$0xff]  }
 0x565   :  { %v3416_v46 = vmul.f32 %v3412_v43, %v5999_v42  ;;  %v5588_v32 = vld [vmem:[#allocation2 + $0xfc0] ss:$16 sps:$4 sm:$0xff]  }
 0x566   :  { %v3417_v50 = vadd.f32 %v3415_v44, %v3413_v47  ;;  %v5589_v33 = vld [vmem:[#allocation2 + $0xec0] ss:$16 sps:$4 sm:$0xff]  }
 0x567   :  { %v3418_v48 = vadd.f32 %v3416_v46, %v3414_v45  ;;  %v5590_v34 = vld [vmem:[#allocation2 + $0xfe0] ss:$16 sps:$4 sm:$0xff]  }
 0x568   :  { %v5591_v35 = vld [vmem:[#allocation2 + $0xee0] ss:$16 sps:$4 sm:$0xff]  }
 0x569   :  { %3516 = vmatprep.mubr.f32.mxu1 %v3418_v48 }
 0x56a   :  { %3517 = vmatmul.mubr.f32.vlgmr.msra.gmra.mrb[6].mxu1 %v3417_v50 }
 0x56b   :  { %3623 = vmatprep.mubr.f32.mxu1 %v5677_v56  ;;  %4897 = vmatpush1.bf16.msra.mxu1 %v4896_v62  ;;  %v3843_v62 = vld [vmem:[%s6271_s2 + $0x328] sm:$0xff] }
 0x56c   :  { %4656 = vmatprep.subr.bf16.mxu1 %v5576_v59  ;;  %v3844_v59 = vld [vmem:[%s6271_s2 + $0x330] sm:$0xff] }
 0x63d   :  { %v4653_v60 = vpop.f32.mrb[6].mxu1 }
 0x63e   :  { %v4654_v61 = vpop.f32.mrb[7].mxu1 }
 0x63f   :  { %v4655_v0 = vadd.f32 %v4654_v61, %v4653_v60  ;;  %v4902_v60 = vpack.c.bf16 %v3844_v59, %v3843_v62  ;;  %v3845_v61 = vld [vmem:[%s6271_s2 + $0x338] sm:$0xff]  ;;  %v3840_v62 = vld [vmem:[%s6271_s2 + $0x310] sm:$0x3] }
 0x641   :  { %v3522_v1 = vmul.f32 0.03125, %v4655_v0  ;;  %v3846_v0 = vld [vmem:[%s6271_s2 + $0x340] sm:$0xff] }
 0x643   :  { %v3523_v2 = vmul.f32 %v3522_v1, %v3522_v1 }
 0x645   :  { %v3525_v3 = vrot.slane %v3523_v2, 7  ;;  %v3847_v2 = vld [vmem:[%s6271_s2 + $0x348] sm:$0xff] }
 0x647   :  { %v3527_v4 = vsub.f32 %v3522_v1, %v3525_v3  ;;  %v3848_v3 = vld [vmem:[%s6271_s2 + $0x350] sm:$0xff] }
 0x649   :  { %v3528_v5 = vmax.f32 %v3527_v4, 0.0  ;;  %v4908_v4 = vpack.c.bf16 %v3848_v3, %v3847_v2 }
 0x64b   :  { %v3529_v6 = vadd.f32 1e-05, %v3528_v5  ;;  %v3849_v5 = vld [vmem:[%s6271_s2 + $0x358] sm:$0xff] }
 0x64d   :  { %5594 = vrsqrt.f32 %v3529_v6  ;;  %v3850_v6 = vld [vmem:[%s6271_s2 + $0x360] sm:$0xff] }
 0x657   :  { %v5595_v55 = vpop.eup %5594 }
 0x658   :  { %v3532_v7 = vrot.slane %v5595_v55, 1  ;;  %v4911_v55 = vpack.c.bf16 %v3850_v6, %v3849_v5  ;;  %v4047_v5 = vld [vmem:[#allocation6 + $0x8] sm:$0xff] }
 0x65a   :  { %v3534_v8 = vmul.f32 %v3532_v7, %v3419_v63  ;;  %v3852_v7 = vld [vmem:[%s6271_s2 + $0x370] sm:$0xff] }
 0x65c   :  { %v3535_v9 = vmul.f32 %v3534_v8, %v3522_v1  ;;  %v3543_v13 = vrot.slane %v3534_v8, %v6014_v28  ;;  %v4905_v1 = vpack.c.bf16 %v3846_v0, %v3845_v61 }
 0x65e   :  { %v3537_v10 = vrot.slane %v3535_v9, 7  ;;  %v3544_v16 = vmul.f32 %v5976_v57, %v3543_v13  ;;  %v3853_v9 = vld [vmem:[%s6271_s2 + $0x378] sm:$0xff] }
 0x660   :  { %v3539_v12 = vsub.f32 %v3419_v63, %v3537_v10  ;;  %v3851_v63 = vld [vmem:[%s6271_s2 + $0x368] sm:$0xff]  ;;  %v3854_v10 = vld [vmem:[%s6271_s2 + $0x380] sm:$0xff] }
 0x661   :  { %v4914_v8 = vpack.c.bf16 %v3852_v7, %v3851_v63  ;;  %v4917_v13 = vpack.c.bf16 %v3854_v10, %v3853_v9  ;;  %v4049_v9 = vld [vmem:[#allocation6 + $0x18] sm:$0xff] }
 0x662   :  { %v3548_v15 = vrot.slane %v3539_v12, %v6017_v30  ;;  %v3855_v12 = vld [vmem:[%s6271_s2 + $0x388] sm:$0xff] }
 0x664   :  { %v3549_v17 = vmul.f32 %v3548_v15, %v5999_v42  ;;  %v3856_v15 = vld [vmem:[%s6271_s2 + $0x390] sm:$0xff] }
 0x666   :  { %v3550_v19 = vadd.f32 %v3549_v17, %v3544_v16  ;;  %v4920_v16 = vpack.c.bf16 %v3856_v15, %v3855_v12  ;;  %v4050_v12 = vld [vmem:[#allocation6 + $0x20] sm:$0xff] }
 0x668   :  { %4532 = vmatmul.mubr.msk.f32.vlgmr.msra.gmra.mrb[8].mxu1 %vm3555_vm3, %v3550_v19 }
 0x669   :  { %4657 = vmatpush3.bf16.msra.mxu1 %v5577_v18 }
 0x66a   :  { %4658 = vmatprep.subr.bf16.mxu1 %v5578_v20 }
 0x66d   :  { %4659 = vmatpush3.bf16.msra.mxu1 %v5579_v21 }
 0x66e   :  { %4660 = vmatprep.subr.bf16.mxu1 %v5580_v22 }
 0x671   :  { %4661 = vmatpush3.bf16.msra.mxu1 %v5581_v23 }
 0x672   :  { %4662 = vmatprep.subr.bf16.mxu1 %v5582_v24 }
 0x675   :  { %4663 = vmatpush3.bf16.msra.mxu1 %v5583_v25 }
 0x676   :  { %4664 = vmatprep.subr.bf16.mxu1 %v5584_v26 }
 0x679   :  { %4665 = vmatpush3.bf16.msra.mxu1 %v5585_v27 }
 0x67a   :  { %4666 = vmatprep.subr.bf16.mxu1 %v5586_v29 }
 0x67d   :  { %4667 = vmatpush3.bf16.msra.mxu1 %v5587_v31 }
 0x67e   :  { %4668 = vmatprep.subr.bf16.mxu1 %v5588_v32 }
 0x681   :  { %4669 = vmatpush3.bf16.msra.mxu1 %v5589_v33 }
 0x682   :  { %4670 = vmatprep.subr.bf16.mxu1 %v5590_v34 }
 0x685   :  { %4671 = vmatpush3.bf16.msra.mxu1 %v5591_v35 }
 0x686   :  { %4898 = vmatprep.subr.bf16.mxu1 %v5678_v36 }
 0x73b   :  { %v3625_v37 = vpop.f32.mrb[8].mxu1 }
 0x73c   :  { %v3633_v38 = vrot.slane %v3625_v37, %v6014_v28  ;;  %v3627_v39 = vpop.f32.mrb[9].mxu1  ;;  %v3643_v43 = vrot.slane %v3625_v37, %v6017_v30 }
 0x73d   :  { %v3637_v40 = vrot.slane %v3627_v39, %v6014_v28  ;;  %v3647_v45 = vrot.slane %v3627_v39, %v6017_v30 }
 0x73e   :  { %v3638_v41 = vmul.f32 %v3633_v38, %v6143_v11  ;;  %v3842_v11 = vld [vmem:[%s6271_s2 + $0x320] sm:$0xff] }
 0x73f   :  { %v3639_v44 = vmul.f32 %v3637_v40, %v6148_v14  ;;  %v4899_v14 = vpack.c.bf16 %v3842_v11, %v3841_v53 }
 0x740   :  { %v3648_v46 = vadd.f32 %v3643_v43, %v3638_v41  ;;  %v3956_v41 = vld [vmem:[#allocation4 + $0x60] sm:$0xff] }
 0x741   :  { %v3649_v47 = vadd.f32 %v3647_v45, %v3639_v44  ;;  %v3957_v43 = vld [vmem:[#allocation4 + $0x80] sm:$0xff] }
 0x742   :  { %v3650_v48 = vmax.f32 %v3648_v46, 0.0  ;;  %v4923_v44 = vpack.c.bf16 %v3957_v43, %v3956_v41  ;;  %v3958_v45 = vld [vmem:[#allocation4 + $0xa0] sm:$0xff] }
 0x743   :  { %v3651_v50 = vmax.f32 %v3649_v47, 0.0  ;;  %v3959_v46 = vld [vmem:[#allocation4 + $0xc0] sm:$0xff] }
 0x744   :  { %v3652_v51 = vmul.f32 %v6069_v49, %v3650_v48  ;;  %v4926_v47 = vpack.c.bf16 %v3959_v46, %v3958_v45 }
 0x745   :  { %v3653_v54 = vmul.f32 %v6069_v49, %v3651_v50 }
 0x746   :  { %v3686_v58 = vpack.c.bf16 %v3652_v51, %v3652_v51 }
 0x747   :  { %v3687_v52 = vpack.c.bf16 %v3653_v54, %v3653_v54 }
 0x749   :  { %3816 = vmatprep.mubr.bf16.mxu1 %v3687_v52 }
 0x74a   :  { %3817 = vmatmul.mubr.bf16.vlgmr.msra.gmra.mrb[12].mxu1 %v3686_v58 }
 0x74b   :  { %4900 = vmatpush3.bf16.msra.mxu1 %v4899_v14  ;;  %4749 = vmatprep.mubr.msk.f32.mxu1 %vm5679_vm4, %v5677_v56 }
 0x74c   :  { %4901 = vmatprep.subr.bf16.mxu1 %v5678_v36 }
 0x74f   :  { %4903 = vmatpush3.bf16.msra.mxu1 %v4902_v60 }
 0x750   :  { %4904 = vmatprep.subr.bf16.mxu1 %v5678_v36 }
 0x753   :  { %4906 = vmatpush3.bf16.msra.mxu1 %v4905_v1 }
 0x754   :  { %4907 = vmatprep.subr.bf16.mxu1 %v5678_v36 }
 0x757   :  { %4909 = vmatpush3.bf16.msra.mxu1 %v4908_v4  ;;  %v4046_v4 = vld [vmem:[#allocation6] sm:$0xff] }
 0x758   :  { %4910 = vmatprep.subr.bf16.mxu1 %v5678_v36  ;;  %v4929_v63 = vpack.c.bf16 %v4047_v5, %v4046_v4 }
 0x75b   :  { %4912 = vmatpush3.bf16.msra.mxu1 %v4911_v55 }
 0x75c   :  { %4913 = vmatprep.subr.bf16.mxu1 %v5678_v36 }
 0x75f   :  { %4915 = vmatpush3.bf16.msra.mxu1 %v4914_v8  ;;  %v4048_v8 = vld [vmem:[#allocation6 + $0x10] sm:$0xff] }
 0x760   :  { %4916 = vmatprep.subr.bf16.mxu1 %v5678_v36  ;;  %v4932_v10 = vpack.c.bf16 %v4049_v9, %v4048_v8 }
 0x763   :  { %4918 = vmatpush3.bf16.msra.mxu1 %v4917_v13  ;;  %v4051_v13 = vld [vmem:[#allocation6 + $0x28] sm:$0xff] }
 0x764   :  { %4919 = vmatprep.subr.bf16.mxu1 %v5678_v36  ;;  %v4935_v15 = vpack.c.bf16 %v4051_v13, %v4050_v12 }
 0x767   :  { %4921 = vmatpush3.bf16.msra.mxu1 %v4920_v16 }
 0x768   :  { %4922 = vmatprep.subr.bf16.mxu1 %v5678_v36 }
 0x81d   :  { %v4672_v17 = vpop.f32.mrb[12].mxu1 }
 0x81e   :  { %v4673_v18 = vpop.f32.mrb[13].mxu1 }
 0x81f   :  { %v6234_v19 = vadd.f32 %v4673_v18, %v4672_v17  ;;  %v4675_v20 = vpop.f32.mrb[14].mxu1  ;;  %v4054_v17 = vld [vmem:[#allocation6 + $0x40] sm:$0xff]  ;;  %v4055_v18 = vld [vmem:[#allocation6 + $0x48] sm:$0xff] }
 0x820   :  { %v4676_v21 = vpop.f32.mrb[15].mxu1  ;;  %v4941_v20 = vpack.c.bf16 %v4055_v18, %v4054_v17 }
 0x821   :  { %v3824_v22 = vrot.slane %v6234_v19, 4  ;;  %v3830_v23 = vmul.f32 %v6234_v19, %v6234_v19  ;;  %v4057_v21 = vld [vmem:[#allocation6 + $0x58] sm:$0xff] }
 0x823   :  { %v3825_v24 = vadd.f32 %v6234_v19, %v3824_v22  ;;  %v3831_v25 = vrot.slane %v3830_v23, 4 }
 0x825   :  { %v3826_v26 = vrot.slane %v3825_v24, 2  ;;  %v3832_v27 = vadd.f32 %v3831_v25, %v3830_v23  ;;  %v4058_v23 = vld [vmem:[#allocation6 + $0x60] sm:$0xff] }
 0x827   :  { %v3827_v29 = vadd.f32 %v3826_v26, %v3825_v24  ;;  %v3833_v31 = vrot.slane %v3832_v27, 2  ;;  %v4059_v24 = vld [vmem:[#allocation6 + $0x68] sm:$0xff]  ;;  %v4060_v26 = vld [vmem:[#allocation6 + $0x70] sm:$0xff] }
 0x828   :  { %v4947_v25 = vpack.c.bf16 %v4059_v24, %v4058_v23 }
 0x829   :  { %v3828_v32 = vrot.slane %v3827_v29, 1  ;;  %v3834_v33 = vadd.f32 %v3833_v31, %v3832_v27  ;;  %v4061_v27 = vld [vmem:[#allocation6 + $0x78] sm:$0xff] }
 0x82b   :  { %v3829_v34 = vadd.f32 %v3828_v32, %v3827_v29  ;;  %v3835_v35 = vrot.slane %v3834_v33, 1  ;;  %v4950_v29 = vpack.c.bf16 %v4061_v27, %v4060_v26 }
 0x82d   :  { %v3836_v37 = vadd.f32 %v3835_v35, %v3834_v33  ;;  %v3837_v38 = vmul.f32 %v5976_v57, %v3829_v34 }
 0x82f   :  { %v3838_v39 = vmul.f32 %v3836_v37, %v5999_v42 }
 0x831   :  { %v3839_v40 = vadd.f32 %v3838_v39, %v3837_v38 }
 0x833   :  { %4750 = vmatmul.mubr.f32.vlgmr.msra.gmra.mrb[10].mxu1 %v3839_v40  ;;  %v4550_v40 = vld [vmem:[#allocation6 + $0x80] ss:$0 sm:$0xff] }
 0x834   :  { %4760 = vmatprep.mubr.msk.f32.mxu1 %vm5679_vm4, %v5677_v56  ;;  %4924 = vmatpush3.bf16.msra.mxu1 %v4923_v44 }
 0x835   :  { %4925 = vmatprep.subr.bf16.mxu1 %v5678_v36 }
 0x838   :  { %4927 = vmatpush3.bf16.msra.mxu1 %v4926_v47 }
 0x839   :  { %4928 = vmatprep.subr.bf16.mxu1 %v5678_v36 }
 0x906   :  { %v3923_v48 = vpop.f32.mrb[10].mxu1 }
 0x907   :  { %v3927_v50 = vmul.f32 0.125, %v3923_v48  ;;  %v4751_v51 = vpop.f32.mrb[11].mxu1 }
 0x909   :  { %v3928_v53 = vmul.f32 %v3927_v50, %v3927_v50 }
 0x90b   :  { %v3930_v11 = vrot.slane %v3928_v53, 7 }
 0x90d   :  { %v3932_v54 = vsub.f32 %v3927_v50, %v3930_v11 }
 0x90f   :  { %v3933_v52 = vmax.f32 %v3932_v54, 0.0 }
 0x911   :  { %v3934_v14 = vadd.f32 1e-05, %v3933_v52 }
 0x913   :  { %5596 = vrsqrt.f32 %v3934_v14 }
 0x91d   :  { %v5597_v58 = vpop.eup %5596 }
 0x91e   :  { %v3937_v59 = vrot.slane %v5597_v58, 1 }
 0x920   :  { %v3939_v60 = vmul.f32 %v3937_v59, %v3840_v62 }
 0x922   :  { %v3940_v61 = vmul.f32 %v3939_v60, %v3927_v50  ;;  %v3948_v2 = vrot.slane %v3939_v60, %v6014_v28 }
 0x924   :  { %v3942_v0 = vrot.slane %v3940_v61, 7  ;;  %v3949_v6 = vmul.f32 %v5976_v57, %v3948_v2  ;;  %v4052_v57 = vld [vmem:[#allocation6 + $0x30] sm:$0xff] }
 0x926   :  { %v3944_v1 = vsub.f32 %v3840_v62, %v3942_v0 }
 0x928   :  { %v3953_v3 = vrot.slane %v3944_v1, %v6017_v30 }
 0x92a   :  { %v3954_v55 = vmul.f32 %v3953_v3, %v5999_v42  ;;  %v4053_v42 = vld [vmem:[#allocation6 + $0x38] sm:$0xff] }
 0x92b   :  { %v4938_v16 = vpack.c.bf16 %v4053_v42, %v4052_v57 }
 0x92c   :  { %v3955_v7 = vadd.f32 %v3954_v55, %v3949_v6 }
 0x92e   :  { %4761 = vmatmul.mubr.msk.f32.vlgmr.msra.gmra.mrb[16].mxu1 %vm3960_vm5, %v3955_v7 }
 0x92f   :  { %4930 = vmatpush3.bf16.msra.mxu1 %v4929_v63  ;;  %4795 = vmatprep.mubr.msk.f32.mxu1 %vm5679_vm4, %v5677_v56  ;;  %v4056_v56 = vld [vmem:[#allocation6 + $0x50] sm:$0xff] }
 0x930   :  { %4931 = vmatprep.subr.bf16.mxu1 %v5678_v36  ;;  %v4944_v22 = vpack.c.bf16 %v4057_v21, %v4056_v56 }
 0x933   :  { %4933 = vmatpush3.bf16.msra.mxu1 %v4932_v10 }
 0x934   :  { %4934 = vmatprep.subr.bf16.mxu1 %v5678_v36 }
 0x937   :  { %4936 = vmatpush3.bf16.msra.mxu1 %v4935_v15 }
 0x938   :  { %4937 = vmatprep.subr.bf16.mxu1 %v5678_v36 }
 0x93b   :  { %4939 = vmatpush3.bf16.msra.mxu1 %v4938_v16 }
 0x93c   :  { %4940 = vmatprep.subr.bf16.mxu1 %v5678_v36 }
 0x93f   :  { %4942 = vmatpush3.bf16.msra.mxu1 %v4941_v20 }
 0x940   :  { %4943 = vmatprep.subr.bf16.mxu1 %v5678_v36 }
 0x943   :  { %4945 = vmatpush3.bf16.msra.mxu1 %v4944_v22 }
 0x944   :  { %4946 = vmatprep.subr.bf16.mxu1 %v5678_v36 }
 0x947   :  { %4948 = vmatpush3.bf16.msra.mxu1 %v4947_v25 }
 0x948   :  { %4949 = vmatprep.subr.bf16.mxu1 %v5678_v36 }
 0x94b   :  { %4951 = vmatpush3.bf16.msra.mxu1 %v4950_v29 }
 0xa01   :  { %v4030_v31 = vpop.f32.mrb[16].mxu1 }
 0xa02   :  { %v4037_v32 = vrot.slane %v4030_v31, %v6014_v28  ;;  %v4762_v33 = vpop.f32.mrb[17].mxu1  ;;  %v4042_v35 = vrot.slane %v4030_v31, %v6017_v30 }
 0xa04   :  { %v4038_v34 = vmul.f32 %v6234_v19, %v4037_v32 }
 0xa06   :  { %v4043_v37 = vadd.f32 %v4042_v35, %v4038_v34 }
 0xa08   :  { %v4044_v38 = vmax.f32 %v4043_v37, 0.0 }
 0xa0a   :  { %v4045_v39 = vmul.f32 %v6069_v49, %v4044_v38 }
 0xa0c   :  { %4796 = vmatmul.mubr.f32.vlgmr.msra.gmra.mrb[18].mxu1 %v4045_v39 }
 0xadf   :  { %v4133_v41 = vpop.f32.mrb[18].mxu1 }
 0xae0   :  { %v4134_v36 = vadd.f32 %v4550_v40, %v4133_v41  ;;  %v4797_v43 = vpop.f32.mrb[19].mxu1 }
 0xae2   :  { %4137 = vst [vmem:[%s6274_s5] sm:$0xff] %v4134_v36 }
 0xae3   :  { %4142 = vsyncpa [#allocation3], 1 }
 0xae4   :  { %4143 = vsyncpa [#allocation5], 1 }

</bundles_post_ra>
